<compile_context>
chip_gen: v6e
topology: v6e:2x2x1
jax: 0.10.0
libtpu: 0.0.40
codegen_flags: <defaults>
</compile_context>

<pallas_src>
import jax
import jax.numpy as jnp
from jax import lax
from jax.experimental import pallas as pl
from jax.experimental.pallas import tpu as pltpu


def lstm_fc_kernel(x_ref,      # (T, BB, I)   float32
                   wih0_ref,   # (I, 4H)      matmul dtype
                   whh0_ref,   # (H, 4H)      matmul dtype
                   b0_ref,     # (1, 4H)      float32  (bih_l0 + bhh_l0)
                   wih1_ref,   # (H, 4H)      matmul dtype
                   whh1_ref,   # (H, 4H)      matmul dtype
                   b1_ref,     # (1, 4H)      float32  (bih_l1 + bhh_l1)
                   fcw_ref,    # (T, H, Cp)   matmul dtype
                   fcb_ref,    # (1, Cp)      float32
                   out_ref,    # (BB, Cp)     float32
                   xproj_ref): # scratch (T, BB, 4H) float32
    T, BB, I = x_ref.shape
    H = whh0_ref.shape[0]
    Cp = out_ref.shape[1]
    mm = whh0_ref.dtype

    # ---- Hoisted layer-0 input projection (no recurrent dependence). ------
    # One (T*BB, I) x (I, 4H) matmul; layer-0 bias folded in once.
    x_all = x_ref[...].reshape(T * BB, I).astype(mm)
    xp = jnp.dot(x_all, wih0_ref[...], preferred_element_type=jnp.float32)
    xproj_ref[...] = xp.reshape(T, BB, 4 * H) + b0_ref[...]

    # Hoist the layer-1 bias broadcast out of the loop (JAX doesn't CSE it).
    b1b = jnp.broadcast_to(b1_ref[...], (BB, 4 * H))

    def gates_to_hc(g, c):
        # Two full-width EUP pushes on the fused (BB, 4H) gates, sliced after.
        # PyTorch gate order (i, f, g, o); elementwise math stays f32.
        sg = jax.nn.sigmoid(g)
        th = jnp.tanh(g)
        i = sg[:, 0 * H:1 * H]
        f = sg[:, 1 * H:2 * H]
        gg = th[:, 2 * H:3 * H]
        o = sg[:, 3 * H:4 * H]
        c_new = f * c + i * gg
        h_new = o * jnp.tanh(c_new)
        return h_new, c_new

    def step(t, carry):
        h0m, c0, h1m, c1, acc = carry
        # Layer-1 recurrent matmul depends only on the PREVIOUS h1: issue it
        # first so the MXU overlaps it with layer-0's EUP/VPU work.
        g1_rec = jnp.dot(h1m, whh1_ref[...], preferred_element_type=jnp.float32)

        # Layer 0: single fused-gate matmul on the recurrent critical path.
        g0 = xproj_ref[t] + jnp.dot(h0m, whh0_ref[...],
                                    preferred_element_type=jnp.float32)
        h0, c0 = gates_to_hc(g0, c0)
        h0m = h0.astype(mm)          # cast once; consumed only by matmuls

        # Layer 1: add the input-term matmul to the early-issued recurrent one.
        g1 = g1_rec + jnp.dot(h0m, wih1_ref[...],
                              preferred_element_type=jnp.float32) + b1b
        h1, c1 = gates_to_hc(g1, c1)
        h1m = h1.astype(mm)

        # FC accumulation: not on the h/c carry chain -> pure MXU filler.
        acc = acc + jnp.dot(h1m, fcw_ref[t], preferred_element_type=jnp.float32)
        return h0m, c0, h1m, c1, acc

    zh = jnp.zeros((BB, H), mm)
    zc = jnp.zeros((BB, H), jnp.float32)
    acc0 = jnp.zeros((BB, Cp), jnp.float32)
    _, _, _, _, acc = lax.fori_loop(0, T, step, (zh, zc, zh, zc, acc0),
                                    unroll=True)
    out_ref[...] = acc + fcb_ref[...]


def _round_up(n, m):
    return ((n + m - 1) // m) * m


def _pick_batch_block(B, max_bb=128):
    """Batch block: big (amortize the serial recurrence), multiple of 8,
    and split into >=2 grid blocks when possible (v7x has 2 TensorCores)."""
    bb = min(_round_up(B, 8), max_bb)
    if B > 8 and _round_up(B, bb) // bb < 2:
        bb = _round_up(pl.cdiv(B, 2), 8)
    return bb


def rnn_lstm_forward(x, params, *, matmul_dtype=jnp.float32, batch_block=None):
    """x: (B, T, I) float32 (batch_first, like the PyTorch module)."""
    B, T, I = x.shape
    H = params["whh_l0"].shape[1]
    C = params["fc_b"].shape[0]

    BB = batch_block if batch_block is not None else _pick_batch_block(B)
    B_pad = _round_up(B, BB)
    C_pad = _round_up(C, 128)      # lane-dense output store inside the kernel
    mmdt = matmul_dtype

    # time-major, batch padded to a multiple of the batch block
    x_tm = jnp.transpose(x.astype(jnp.float32), (1, 0, 2))            # (T,B,I)
    x_tm = jnp.pad(x_tm, ((0, 0), (0, B_pad - B), (0, 0)))

    # fused-gate weights: (in_dim, 4H); PyTorch gate order (i,f,g,o) preserved
    wih0 = params["wih_l0"].T.astype(mmdt)                            # (I, 4H)
    whh0 = params["whh_l0"].T.astype(mmdt)                            # (H, 4H)
    b0 = (params["bih_l0"] + params["bhh_l0"]).reshape(1, 4 * H).astype(jnp.float32)
    wih1 = params["wih_l1"].T.astype(mmdt)                            # (H, 4H)
    whh1 = params["whh_l1"].T.astype(mmdt)                            # (H, 4H)
    b1 = (params["bih_l1"] + params["bhh_l1"]).reshape(1, 4 * H).astype(jnp.float32)

    # FC weight as (T, H, C_pad): flatten+Linear == sum_t h1_t @ fcw[t]
    fcw = jnp.transpose(params["fc_w"].reshape(C, T, H), (1, 2, 0))   # (T,H,C)
    fcw = jnp.pad(fcw, ((0, 0), (0, 0), (0, C_pad - C))).astype(mmdt)
    fcb = jnp.pad(params["fc_b"], (0, C_pad - C)).reshape(1, C_pad).astype(jnp.float32)

    out = pl.pallas_call(
        lstm_fc_kernel,
        out_shape=jax.ShapeDtypeStruct((B_pad, C_pad), jnp.float32),
        grid_spec=pltpu.PrefetchScalarGridSpec(
            num_scalar_prefetch=0,
            grid=(B_pad // BB,),
            in_specs=[
                pl.BlockSpec((T, BB, I), lambda b: (0, b, 0)),
                pl.BlockSpec((I, 4 * H), lambda b: (0, 0)),
                pl.BlockSpec((H, 4 * H), lambda b: (0, 0)),
                pl.BlockSpec((1, 4 * H), lambda b: (0, 0)),
                pl.BlockSpec((H, 4 * H), lambda b: (0, 0)),
                pl.BlockSpec((H, 4 * H), lambda b: (0, 0)),
                pl.BlockSpec((1, 4 * H), lambda b: (0, 0)),
                pl.BlockSpec((T, H, C_pad), lambda b: (0, 0, 0)),
                pl.BlockSpec((1, C_pad), lambda b: (0, 0)),
            ],
            out_specs=pl.BlockSpec((BB, C_pad), lambda b: (b, 0)),
            scratch_shapes=[
                pltpu.VMEM((T, BB, 4 * H), jnp.float32),  # hoisted input proj
            ],
        ),
        compiler_params=pltpu.CompilerParams(
            # batch blocks are independent -> megacore-shardable (v7x 2 TCs)
            dimension_semantics=("parallel",)),
    )(x_tm, wih0, whh0, b0, wih1, whh1, b1, fcw, fcb)
    return out[:B, :C]


def reference_forward(x, params, H):
    """Pure-JAX reference matching torch.nn.LSTM(num_layers=2, batch_first) + Linear."""
    B, T, _ = x.shape

    def lstm_layer(inp, wih, whh, bih, bhh):
        h = jnp.zeros((B, H), jnp.float32)
        c = jnp.zeros((B, H), jnp.float32)
        outs = []
        for t in range(T):
            g = inp[:, t, :] @ wih.T + h @ whh.T + bih + bhh
            i = jax.nn.sigmoid(g[:, 0 * H:1 * H])
            f = jax.nn.sigmoid(g[:, 1 * H:2 * H])
            gg = jnp.tanh(g[:, 2 * H:3 * H])
            o = jax.nn.sigmoid(g[:, 3 * H:4 * H])
            c = f * c + i * gg
            h = o * jnp.tanh(c)
            outs.append(h)
        return jnp.stack(outs, axis=1)

    out0 = lstm_layer(x, params["wih_l0"], params["whh_l0"],
                      params["bih_l0"], params["bhh_l0"])
    out1 = lstm_layer(out0, params["wih_l1"], params["whh_l1"],
                      params["bih_l1"], params["bhh_l1"])
    flat = out1.reshape(B, -1)
    return flat @ params["fc_w"].T + params["fc_b"]


if __name__ == "__main__":
    # Small shapes consistent with the module (hidden=32 -> 4H=128 lanes).
    B, T, I, H, C = 4, 8, 16, 32, 10

    key = jax.random.PRNGKey(0)
    ks = jax.random.split(key, 11)
    s = 0.1
    params = {
        "wih_l0": s * jax.random.normal(ks[0], (4 * H, I), jnp.float32),
        "whh_l0": s * jax.random.normal(ks[1], (4 * H, H), jnp.float32),
        "bih_l0": s * jax.random.normal(ks[2], (4 * H,), jnp.float32),
        "bhh_l0": s * jax.random.normal(ks[3], (4 * H,), jnp.float32),
        "wih_l1": s * jax.random.normal(ks[4], (4 * H, H), jnp.float32),
        "whh_l1": s * jax.random.normal(ks[5], (4 * H, H), jnp.float32),
        "bih_l1": s * jax.random.normal(ks[6], (4 * H,), jnp.float32),
        "bhh_l1": s * jax.random.normal(ks[7], (4 * H,), jnp.float32),
        "fc_w": s * jax.random.normal(ks[8], (C, T * H), jnp.float32),
        "fc_b": s * jax.random.normal(ks[9], (C,), jnp.float32),
    }
    x = jax.random.normal(ks[10], (B, T, I), jnp.float32)
    ref = jax.block_until_ready(reference_forward(x, params, H))

    # f32 MXU operands
    out_f32 = jax.block_until_ready(rnn_lstm_forward(x, params))
    assert out_f32.shape == (B, C)
    assert jnp.allclose(out_f32, ref, atol=1e-4, rtol=1e-4), (
        f"f32 mismatch: max abs err {jnp.max(jnp.abs(out_f32 - ref))}")

    # bf16 MXU operands (MXU-native on all generations), f32 accumulate +
    # f32 cell/gate elementwise math
    out_bf16 = jax.block_until_ready(
        rnn_lstm_forward(x, params, matmul_dtype=jnp.bfloat16))
    assert jnp.allclose(out_bf16, ref, atol=5e-2, rtol=5e-2), (
        f"bf16 mismatch: max abs err {jnp.max(jnp.abs(out_bf16 - ref))}")

    # ragged batch: exercises padding + the >=2-block parallel batch grid
    x2 = jax.random.normal(jax.random.PRNGKey(1), (13, T, I), jnp.float32)
    out2 = jax.block_until_ready(rnn_lstm_forward(x2, params))
    ref2 = reference_forward(x2, params, H)
    assert jnp.allclose(out2, ref2, atol=1e-4, rtol=1e-4), (
        f"padded-batch mismatch: max abs err {jnp.max(jnp.abs(out2 - ref2))}")

    # larger batch: exercises the auto-sized (large) batch block
    x3 = jax.random.normal(jax.random.PRNGKey(2), (40, T, I), jnp.float32)
    out3 = jax.block_until_ready(rnn_lstm_forward(x3, params))
    ref3 = reference_forward(x3, params, H)
    assert jnp.allclose(out3, ref3, atol=1e-4, rtol=1e-4), (
        f"large-batch mismatch: max abs err {jnp.max(jnp.abs(out3 - ref3))}")

    print("KERNEL_OK")
</pallas_src>

<mosaic_0001>
module attributes {stable_mosaic.version = 11 : i64} {
  func.func @lstm_fc_kernel(%arg0: i32, %arg1: memref<8x8x16xf32, #tpu.memory_space<vmem>>, %arg2: memref<16x128xf32, #tpu.memory_space<vmem>>, %arg3: memref<32x128xf32, #tpu.memory_space<vmem>>, %arg4: memref<1x128xf32, #tpu.memory_space<vmem>>, %arg5: memref<32x128xf32, #tpu.memory_space<vmem>>, %arg6: memref<32x128xf32, #tpu.memory_space<vmem>>, %arg7: memref<1x128xf32, #tpu.memory_space<vmem>>, %arg8: memref<8x32x128xf32, #tpu.memory_space<vmem>>, %arg9: memref<1x128xf32, #tpu.memory_space<vmem>>, %arg10: memref<8x128xf32, #tpu.memory_space<vmem>>, %arg11: memref<8x8x128xf32, #tpu.memory_space<vmem>>) attributes {dimension_semantics = [#tpu.dimension_semantics<parallel>], iteration_bounds = array<i64: 1>, scalar_prefetch = 0 : i64, scratch_operands = 1 : i64, tpu.core_type = #tpu.core_type<tc>, window_params = [{transform_indices = @transform_0, window_bounds = array<i64: 8, 8, 16>}, {pipeline_mode = #tpu.pipeline_mode<synchronous>, transform_indices = @transform_1, window_bounds = array<i64: 16, 128>}, {pipeline_mode = #tpu.pipeline_mode<synchronous>, transform_indices = @transform_2, window_bounds = array<i64: 32, 128>}, {pipeline_mode = #tpu.pipeline_mode<synchronous>, transform_indices = @transform_3, window_bounds = array<i64: 1, 128>}, {pipeline_mode = #tpu.pipeline_mode<synchronous>, transform_indices = @transform_4, window_bounds = array<i64: 32, 128>}, {pipeline_mode = #tpu.pipeline_mode<synchronous>, transform_indices = @transform_5, window_bounds = array<i64: 32, 128>}, {pipeline_mode = #tpu.pipeline_mode<synchronous>, transform_indices = @transform_6, window_bounds = array<i64: 1, 128>}, {pipeline_mode = #tpu.pipeline_mode<synchronous>, transform_indices = @transform_7, window_bounds = array<i64: 8, 32, 128>}, {pipeline_mode = #tpu.pipeline_mode<synchronous>, transform_indices = @transform_8, window_bounds = array<i64: 1, 128>}, {transform_indices = @transform_9, window_bounds = array<i64: 8, 128>}]} {
    %c0 = arith.constant 0 : index
    %c0_0 = arith.constant 0 : index
    %c0_1 = arith.constant 0 : index
    %0 = vector.load %arg1[%c0, %c0_0, %c0_1] : memref<8x8x16xf32, #tpu.memory_space<vmem>>, vector<8x8x16xf32>
    %1 = vector.shape_cast %0 : vector<8x8x16xf32> to vector<64x16xf32>
    %c0_2 = arith.constant 0 : index
    %c0_3 = arith.constant 0 : index
    %2 = vector.load %arg2[%c0_2, %c0_3] : memref<16x128xf32, #tpu.memory_space<vmem>>, vector<16x128xf32>
    %cst = arith.constant dense<0.000000e+00> : vector<64x128xf32>
    %3 = tpu.matmul %1, %2, %cst {dimension_numbers = #tpu.dot_dimension_numbers<[1], [0], [0], [1], [0, 0, 1, 1], [], []>} : vector<64x16xf32>, vector<16x128xf32>, vector<64x128xf32> -> vector<64x128xf32>
    %4 = vector.shape_cast %3 : vector<64x128xf32> to vector<8x8x128xf32>
    %c0_4 = arith.constant 0 : index
    %c0_5 = arith.constant 0 : index
    %5 = vector.load %arg4[%c0_4, %c0_5] : memref<1x128xf32, #tpu.memory_space<vmem>>, vector<1x128xf32>
    %6 = vector.shape_cast %5 : vector<1x128xf32> to vector<1x1x128xf32>
    %7 = vector.broadcast %6 : vector<1x1x128xf32> to vector<8x8x128xf32>
    %8 = arith.addf %4, %7 : vector<8x8x128xf32>
    %c0_6 = arith.constant 0 : index
    %c0_7 = arith.constant 0 : index
    %c0_8 = arith.constant 0 : index
    %9 = vector.load %arg11[%c0_6, %c0_7, %c0_8] : memref<8x8x128xf32, #tpu.memory_space<vmem>>, vector<8x8x128xf32>
    tpu.vector_store %arg11[%c0_6, %c0_7, %c0_8], %8 {strides = array<i32>} : memref<8x8x128xf32, #tpu.memory_space<vmem>>, vector<8x8x128xf32>,
    %c0_9 = arith.constant 0 : index
    %c0_10 = arith.constant 0 : index
    %10 = vector.load %arg7[%c0_9, %c0_10] : memref<1x128xf32, #tpu.memory_space<vmem>>, vector<1x128xf32>
    %11 = vector.shape_cast %10 : vector<1x128xf32> to vector<1x128xf32>
    %12 = vector.broadcast %11 : vector<1x128xf32> to vector<8x128xf32>
    %cst_11 = arith.constant 0.000000e+00 : f32
    %13 = vector.broadcast %cst_11 : f32 to vector<8x32xf32>
    %cst_12 = arith.constant 0.000000e+00 : f32
    %14 = vector.broadcast %cst_12 : f32 to vector<8x32xf32>
    %cst_13 = arith.constant 0.000000e+00 : f32
    %15 = vector.broadcast %cst_13 : f32 to vector<8x128xf32>
    %c0_i32 = arith.constant 0 : i32
    %c0_14 = arith.constant 0 : index
    %c0_15 = arith.constant 0 : index
    %16 = vector.load %arg6[%c0_14, %c0_15] : memref<32x128xf32, #tpu.memory_space<vmem>>, vector<32x128xf32>
    %cst_16 = arith.constant dense<0.000000e+00> : vector<8x128xf32>
    %17 = tpu.matmul %13, %16, %cst_16 {dimension_numbers = #tpu.dot_dimension_numbers<[1], [0], [0], [1], [0, 0, 1, 1], [], []>} : vector<8x32xf32>, vector<32x128xf32>, vector<8x128xf32> -> vector<8x128xf32>
    %18 = arith.index_cast %c0_i32 : i32 to index
    %c0_17 = arith.constant 0 : index
    %c0_18 = arith.constant 0 : index
    %19 = vector.load %arg11[%18, %c0_17, %c0_18] : memref<8x8x128xf32, #tpu.memory_space<vmem>>, vector<1x8x128xf32>
    %20 = vector.shape_cast %19 : vector<1x8x128xf32> to vector<8x128xf32>
    %c0_19 = arith.constant 0 : index
    %c0_20 = arith.constant 0 : index
    %21 = vector.load %arg3[%c0_19, %c0_20] : memref<32x128xf32, #tpu.memory_space<vmem>>, vector<32x128xf32>
    %cst_21 = arith.constant dense<0.000000e+00> : vector<8x128xf32>
    %22 = tpu.matmul %13, %21, %cst_21 {dimension_numbers = #tpu.dot_dimension_numbers<[1], [0], [0], [1], [0, 0, 1, 1], [], []>} : vector<8x32xf32>, vector<32x128xf32>, vector<8x128xf32> -> vector<8x128xf32>
    %23 = arith.addf %20, %22 : vector<8x128xf32>
    %24 = arith.negf %23 : vector<8x128xf32>
    %25 = math.exp %24 : vector<8x128xf32>
    %cst_22 = arith.constant 1.000000e+00 : f32
    %26 = vector.broadcast %cst_22 : f32 to vector<8x128xf32>
    %27 = arith.addf %26, %25 : vector<8x128xf32>
    %28 = arith.divf %26, %27 : vector<8x128xf32>
    %29 = math.tanh %23 : vector<8x128xf32>
    %30 = vector.extract_strided_slice %28 {offsets = [0, 0], sizes = [8, 32], strides = [1, 1]} : vector<8x128xf32> to vector<8x32xf32>
    %31 = vector.extract_strided_slice %28 {offsets = [0, 32], sizes = [8, 32], strides = [1, 1]} : vector<8x128xf32> to vector<8x32xf32>
    %32 = vector.extract_strided_slice %29 {offsets = [0, 64], sizes = [8, 32], strides = [1, 1]} : vector<8x128xf32> to vector<8x32xf32>
    %33 = vector.extract_strided_slice %28 {offsets = [0, 96], sizes = [8, 32], strides = [1, 1]} : vector<8x128xf32> to vector<8x32xf32>
    %34 = arith.mulf %31, %14 : vector<8x32xf32>
    %35 = arith.mulf %30, %32 : vector<8x32xf32>
    %36 = arith.addf %34, %35 : vector<8x32xf32>
    %37 = math.tanh %36 : vector<8x32xf32>
    %38 = arith.mulf %33, %37 : vector<8x32xf32>
    %c0_23 = arith.constant 0 : index
    %c0_24 = arith.constant 0 : index
    %39 = vector.load %arg5[%c0_23, %c0_24] : memref<32x128xf32, #tpu.memory_space<vmem>>, vector<32x128xf32>
    %cst_25 = arith.constant dense<0.000000e+00> : vector<8x128xf32>
    %40 = tpu.matmul %38, %39, %cst_25 {dimension_numbers = #tpu.dot_dimension_numbers<[1], [0], [0], [1], [0, 0, 1, 1], [], []>} : vector<8x32xf32>, vector<32x128xf32>, vector<8x128xf32> -> vector<8x128xf32>
    %41 = arith.addf %17, %40 : vector<8x128xf32>
    %42 = arith.addf %41, %12 : vector<8x128xf32>
    %43 = arith.negf %42 : vector<8x128xf32>
    %44 = math.exp %43 : vector<8x128xf32>
    %cst_26 = arith.constant 1.000000e+00 : f32
    %45 = vector.broadcast %cst_26 : f32 to vector<8x128xf32>
    %46 = arith.addf %45, %44 : vector<8x128xf32>
    %47 = arith.divf %45, %46 : vector<8x128xf32>
    %48 = math.tanh %42 : vector<8x128xf32>
    %49 = vector.extract_strided_slice %47 {offsets = [0, 0], sizes = [8, 32], strides = [1, 1]} : vector<8x128xf32> to vector<8x32xf32>
    %50 = vector.extract_strided_slice %47 {offsets = [0, 32], sizes = [8, 32], strides = [1, 1]} : vector<8x128xf32> to vector<8x32xf32>
    %51 = vector.extract_strided_slice %48 {offsets = [0, 64], sizes = [8, 32], strides = [1, 1]} : vector<8x128xf32> to vector<8x32xf32>
    %52 = vector.extract_strided_slice %47 {offsets = [0, 96], sizes = [8, 32], strides = [1, 1]} : vector<8x128xf32> to vector<8x32xf32>
    %53 = arith.mulf %50, %14 : vector<8x32xf32>
    %54 = arith.mulf %49, %51 : vector<8x32xf32>
    %55 = arith.addf %53, %54 : vector<8x32xf32>
    %56 = math.tanh %55 : vector<8x32xf32>
    %57 = arith.mulf %52, %56 : vector<8x32xf32>
    %58 = arith.index_cast %c0_i32 : i32 to index
    %c0_27 = arith.constant 0 : index
    %c0_28 = arith.constant 0 : index
    %59 = vector.load %arg8[%58, %c0_27, %c0_28] : memref<8x32x128xf32, #tpu.memory_space<vmem>>, vector<1x32x128xf32>
    %60 = vector.shape_cast %59 : vector<1x32x128xf32> to vector<32x128xf32>
    %cst_29 = arith.constant dense<0.000000e+00> : vector<8x128xf32>
    %61 = tpu.matmul %57, %60, %cst_29 {dimension_numbers = #tpu.dot_dimension_numbers<[1], [0], [0], [1], [0, 0, 1, 1], [], []>} : vector<8x32xf32>, vector<32x128xf32>, vector<8x128xf32> -> vector<8x128xf32>
    %62 = arith.addf %15, %61 : vector<8x128xf32>
    %c1_i32 = arith.constant 1 : i32
    %c0_30 = arith.constant 0 : index
    %c0_31 = arith.constant 0 : index
    %63 = vector.load %arg6[%c0_30, %c0_31] : memref<32x128xf32, #tpu.memory_space<vmem>>, vector<32x128xf32>
    %cst_32 = arith.constant dense<0.000000e+00> : vector<8x128xf32>
    %64 = tpu.matmul %57, %63, %cst_32 {dimension_numbers = #tpu.dot_dimension_numbers<[1], [0], [0], [1], [0, 0, 1, 1], [], []>} : vector<8x32xf32>, vector<32x128xf32>, vector<8x128xf32> -> vector<8x128xf32>
    %65 = arith.index_cast %c1_i32 : i32 to index
    %c0_33 = arith.constant 0 : index
    %c0_34 = arith.constant 0 : index
    %66 = vector.load %arg11[%65, %c0_33, %c0_34] : memref<8x8x128xf32, #tpu.memory_space<vmem>>, vector<1x8x128xf32>
    %67 = vector.shape_cast %66 : vector<1x8x128xf32> to vector<8x128xf32>
    %c0_35 = arith.constant 0 : index
    %c0_36 = arith.constant 0 : index
    %68 = vector.load %arg3[%c0_35, %c0_36] : memref<32x128xf32, #tpu.memory_space<vmem>>, vector<32x128xf32>
    %cst_37 = arith.constant dense<0.000000e+00> : vector<8x128xf32>
    %69 = tpu.matmul %38, %68, %cst_37 {dimension_numbers = #tpu.dot_dimension_numbers<[1], [0], [0], [1], [0, 0, 1, 1], [], []>} : vector<8x32xf32>, vector<32x128xf32>, vector<8x128xf32> -> vector<8x128xf32>
    %70 = arith.addf %67, %69 : vector<8x128xf32>
    %71 = arith.negf %70 : vector<8x128xf32>
    %72 = math.exp %71 : vector<8x128xf32>
    %cst_38 = arith.constant 1.000000e+00 : f32
    %73 = vector.broadcast %cst_38 : f32 to vector<8x128xf32>
    %74 = arith.addf %73, %72 : vector<8x128xf32>
    %75 = arith.divf %73, %74 : vector<8x128xf32>
    %76 = math.tanh %70 : vector<8x128xf32>
    %77 = vector.extract_strided_slice %75 {offsets = [0, 0], sizes = [8, 32], strides = [1, 1]} : vector<8x128xf32> to vector<8x32xf32>
    %78 = vector.extract_strided_slice %75 {offsets = [0, 32], sizes = [8, 32], strides = [1, 1]} : vector<8x128xf32> to vector<8x32xf32>
    %79 = vector.extract_strided_slice %76 {offsets = [0, 64], sizes = [8, 32], strides = [1, 1]} : vector<8x128xf32> to vector<8x32xf32>
    %80 = vector.extract_strided_slice %75 {offsets = [0, 96], sizes = [8, 32], strides = [1, 1]} : vector<8x128xf32> to vector<8x32xf32>
    %81 = arith.mulf %78, %36 : vector<8x32xf32>
    %82 = arith.mulf %77, %79 : vector<8x32xf32>
    %83 = arith.addf %81, %82 : vector<8x32xf32>
    %84 = math.tanh %83 : vector<8x32xf32>
    %85 = arith.mulf %80, %84 : vector<8x32xf32>
    %c0_39 = arith.constant 0 : index
    %c0_40 = arith.constant 0 : index
    %86 = vector.load %arg5[%c0_39, %c0_40] : memref<32x128xf32, #tpu.memory_space<vmem>>, vector<32x128xf32>
    %cst_41 = arith.constant dense<0.000000e+00> : vector<8x128xf32>
    %87 = tpu.matmul %85, %86, %cst_41 {dimension_numbers = #tpu.dot_dimension_numbers<[1], [0], [0], [1], [0, 0, 1, 1], [], []>} : vector<8x32xf32>, vector<32x128xf32>, vector<8x128xf32> -> vector<8x128xf32>
    %88 = arith.addf %64, %87 : vector<8x128xf32>
    %89 = arith.addf %88, %12 : vector<8x128xf32>
    %90 = arith.negf %89 : vector<8x128xf32>
    %91 = math.exp %90 : vector<8x128xf32>
    %cst_42 = arith.constant 1.000000e+00 : f32
    %92 = vector.broadcast %cst_42 : f32 to vector<8x128xf32>
    %93 = arith.addf %92, %91 : vector<8x128xf32>
    %94 = arith.divf %92, %93 : vector<8x128xf32>
    %95 = math.tanh %89 : vector<8x128xf32>
    %96 = vector.extract_strided_slice %94 {offsets = [0, 0], sizes = [8, 32], strides = [1, 1]} : vector<8x128xf32> to vector<8x32xf32>
    %97 = vector.extract_strided_slice %94 {offsets = [0, 32], sizes = [8, 32], strides = [1, 1]} : vector<8x128xf32> to vector<8x32xf32>
    %98 = vector.extract_strided_slice %95 {offsets = [0, 64], sizes = [8, 32], strides = [1, 1]} : vector<8x128xf32> to vector<8x32xf32>
    %99 = vector.extract_strided_slice %94 {offsets = [0, 96], sizes = [8, 32], strides = [1, 1]} : vector<8x128xf32> to vector<8x32xf32>
    %100 = arith.mulf %97, %55 : vector<8x32xf32>
    %101 = arith.mulf %96, %98 : vector<8x32xf32>
    %102 = arith.addf %100, %101 : vector<8x32xf32>
    %103 = math.tanh %102 : vector<8x32xf32>
    %104 = arith.mulf %99, %103 : vector<8x32xf32>
    %105 = arith.index_cast %c1_i32 : i32 to index
    %c0_43 = arith.constant 0 : index
    %c0_44 = arith.constant 0 : index
    %106 = vector.load %arg8[%105, %c0_43, %c0_44] : memref<8x32x128xf32, #tpu.memory_space<vmem>>, vector<1x32x128xf32>
    %107 = vector.shape_cast %106 : vector<1x32x128xf32> to vector<32x128xf32>
    %cst_45 = arith.constant dense<0.000000e+00> : vector<8x128xf32>
    %108 = tpu.matmul %104, %107, %cst_45 {dimension_numbers = #tpu.dot_dimension_numbers<[1], [0], [0], [1], [0, 0, 1, 1], [], []>} : vector<8x32xf32>, vector<32x128xf32>, vector<8x128xf32> -> vector<8x128xf32>
    %109 = arith.addf %62, %108 : vector<8x128xf32>
    %c2_i32 = arith.constant 2 : i32
    %c0_46 = arith.constant 0 : index
    %c0_47 = arith.constant 0 : index
    %110 = vector.load %arg6[%c0_46, %c0_47] : memref<32x128xf32, #tpu.memory_space<vmem>>, vector<32x128xf32>
    %cst_48 = arith.constant dense<0.000000e+00> : vector<8x128xf32>
    %111 = tpu.matmul %104, %110, %cst_48 {dimension_numbers = #tpu.dot_dimension_numbers<[1], [0], [0], [1], [0, 0, 1, 1], [], []>} : vector<8x32xf32>, vector<32x128xf32>, vector<8x128xf32> -> vector<8x128xf32>
    %112 = arith.index_cast %c2_i32 : i32 to index
    %c0_49 = arith.constant 0 : index
    %c0_50 = arith.constant 0 : index
    %113 = vector.load %arg11[%112, %c0_49, %c0_50] : memref<8x8x128xf32, #tpu.memory_space<vmem>>, vector<1x8x128xf32>
    %114 = vector.shape_cast %113 : vector<1x8x128xf32> to vector<8x128xf32>
    %c0_51 = arith.constant 0 : index
    %c0_52 = arith.constant 0 : index
    %115 = vector.load %arg3[%c0_51, %c0_52] : memref<32x128xf32, #tpu.memory_space<vmem>>, vector<32x128xf32>
    %cst_53 = arith.constant dense<0.000000e+00> : vector<8x128xf32>
    %116 = tpu.matmul %85, %115, %cst_53 {dimension_numbers = #tpu.dot_dimension_numbers<[1], [0], [0], [1], [0, 0, 1, 1], [], []>} : vector<8x32xf32>, vector<32x128xf32>, vector<8x128xf32> -> vector<8x128xf32>
    %117 = arith.addf %114, %116 : vector<8x128xf32>
    %118 = arith.negf %117 : vector<8x128xf32>
    %119 = math.exp %118 : vector<8x128xf32>
    %cst_54 = arith.constant 1.000000e+00 : f32
    %120 = vector.broadcast %cst_54 : f32 to vector<8x128xf32>
    %121 = arith.addf %120, %119 : vector<8x128xf32>
    %122 = arith.divf %120, %121 : vector<8x128xf32>
    %123 = math.tanh %117 : vector<8x128xf32>
    %124 = vector.extract_strided_slice %122 {offsets = [0, 0], sizes = [8, 32], strides = [1, 1]} : vector<8x128xf32> to vector<8x32xf32>
    %125 = vector.extract_strided_slice %122 {offsets = [0, 32], sizes = [8, 32], strides = [1, 1]} : vector<8x128xf32> to vector<8x32xf32>
    %126 = vector.extract_strided_slice %123 {offsets = [0, 64], sizes = [8, 32], strides = [1, 1]} : vector<8x128xf32> to vector<8x32xf32>
    %127 = vector.extract_strided_slice %122 {offsets = [0, 96], sizes = [8, 32], strides = [1, 1]} : vector<8x128xf32> to vector<8x32xf32>
    %128 = arith.mulf %125, %83 : vector<8x32xf32>
    %129 = arith.mulf %124, %126 : vector<8x32xf32>
    %130 = arith.addf %128, %129 : vector<8x32xf32>
    %131 = math.tanh %130 : vector<8x32xf32>
    %132 = arith.mulf %127, %131 : vector<8x32xf32>
    %c0_55 = arith.constant 0 : index
    %c0_56 = arith.constant 0 : index
    %133 = vector.load %arg5[%c0_55, %c0_56] : memref<32x128xf32, #tpu.memory_space<vmem>>, vector<32x128xf32>
    %cst_57 = arith.constant dense<0.000000e+00> : vector<8x128xf32>
    %134 = tpu.matmul %132, %133, %cst_57 {dimension_numbers = #tpu.dot_dimension_numbers<[1], [0], [0], [1], [0, 0, 1, 1], [], []>} : vector<8x32xf32>, vector<32x128xf32>, vector<8x128xf32> -> vector<8x128xf32>
    %135 = arith.addf %111, %134 : vector<8x128xf32>
    %136 = arith.addf %135, %12 : vector<8x128xf32>
    %137 = arith.negf %136 : vector<8x128xf32>
    %138 = math.exp %137 : vector<8x128xf32>
    %cst_58 = arith.constant 1.000000e+00 : f32
    %139 = vector.broadcast %cst_58 : f32 to vector<8x128xf32>
    %140 = arith.addf %139, %138 : vector<8x128xf32>
    %141 = arith.divf %139, %140 : vector<8x128xf32>
    %142 = math.tanh %136 : vector<8x128xf32>
    %143 = vector.extract_strided_slice %141 {offsets = [0, 0], sizes = [8, 32], strides = [1, 1]} : vector<8x128xf32> to vector<8x32xf32>
    %144 = vector.extract_strided_slice %141 {offsets = [0, 32], sizes = [8, 32], strides = [1, 1]} : vector<8x128xf32> to vector<8x32xf32>
    %145 = vector.extract_strided_slice %142 {offsets = [0, 64], sizes = [8, 32], strides = [1, 1]} : vector<8x128xf32> to vector<8x32xf32>
    %146 = vector.extract_strided_slice %141 {offsets = [0, 96], sizes = [8, 32], strides = [1, 1]} : vector<8x128xf32> to vector<8x32xf32>
    %147 = arith.mulf %144, %102 : vector<8x32xf32>
    %148 = arith.mulf %143, %145 : vector<8x32xf32>
    %149 = arith.addf %147, %148 : vector<8x32xf32>
    %150 = math.tanh %149 : vector<8x32xf32>
    %151 = arith.mulf %146, %150 : vector<8x32xf32>
    %152 = arith.index_cast %c2_i32 : i32 to index
    %c0_59 = arith.constant 0 : index
    %c0_60 = arith.constant 0 : index
    %153 = vector.load %arg8[%152, %c0_59, %c0_60] : memref<8x32x128xf32, #tpu.memory_space<vmem>>, vector<1x32x128xf32>
    %154 = vector.shape_cast %153 : vector<1x32x128xf32> to vector<32x128xf32>
    %cst_61 = arith.constant dense<0.000000e+00> : vector<8x128xf32>
    %155 = tpu.matmul %151, %154, %cst_61 {dimension_numbers = #tpu.dot_dimension_numbers<[1], [0], [0], [1], [0, 0, 1, 1], [], []>} : vector<8x32xf32>, vector<32x128xf32>, vector<8x128xf32> -> vector<8x128xf32>
    %156 = arith.addf %109, %155 : vector<8x128xf32>
    %c3_i32 = arith.constant 3 : i32
    %c0_62 = arith.constant 0 : index
    %c0_63 = arith.constant 0 : index
    %157 = vector.load %arg6[%c0_62, %c0_63] : memref<32x128xf32, #tpu.memory_space<vmem>>, vector<32x128xf32>
    %cst_64 = arith.constant dense<0.000000e+00> : vector<8x128xf32>
    %158 = tpu.matmul %151, %157, %cst_64 {dimension_numbers = #tpu.dot_dimension_numbers<[1], [0], [0], [1], [0, 0, 1, 1], [], []>} : vector<8x32xf32>, vector<32x128xf32>, vector<8x128xf32> -> vector<8x128xf32>
    %159 = arith.index_cast %c3_i32 : i32 to index
    %c0_65 = arith.constant 0 : index
    %c0_66 = arith.constant 0 : index
    %160 = vector.load %arg11[%159, %c0_65, %c0_66] : memref<8x8x128xf32, #tpu.memory_space<vmem>>, vector<1x8x128xf32>
    %161 = vector.shape_cast %160 : vector<1x8x128xf32> to vector<8x128xf32>
    %c0_67 = arith.constant 0 : index
    %c0_68 = arith.constant 0 : index
    %162 = vector.load %arg3[%c0_67, %c0_68] : memref<32x128xf32, #tpu.memory_space<vmem>>, vector<32x128xf32>
    %cst_69 = arith.constant dense<0.000000e+00> : vector<8x128xf32>
    %163 = tpu.matmul %132, %162, %cst_69 {dimension_numbers = #tpu.dot_dimension_numbers<[1], [0], [0], [1], [0, 0, 1, 1], [], []>} : vector<8x32xf32>, vector<32x128xf32>, vector<8x128xf32> -> vector<8x128xf32>
    %164 = arith.addf %161, %163 : vector<8x128xf32>
    %165 = arith.negf %164 : vector<8x128xf32>
    %166 = math.exp %165 : vector<8x128xf32>
    %cst_70 = arith.constant 1.000000e+00 : f32
    %167 = vector.broadcast %cst_70 : f32 to vector<8x128xf32>
    %168 = arith.addf %167, %166 : vector<8x128xf32>
    %169 = arith.divf %167, %168 : vector<8x128xf32>
    %170 = math.tanh %164 : vector<8x128xf32>
    %171 = vector.extract_strided_slice %169 {offsets = [0, 0], sizes = [8, 32], strides = [1, 1]} : vector<8x128xf32> to vector<8x32xf32>
    %172 = vector.extract_strided_slice %169 {offsets = [0, 32], sizes = [8, 32], strides = [1, 1]} : vector<8x128xf32> to vector<8x32xf32>
    %173 = vector.extract_strided_slice %170 {offsets = [0, 64], sizes = [8, 32], strides = [1, 1]} : vector<8x128xf32> to vector<8x32xf32>
    %174 = vector.extract_strided_slice %169 {offsets = [0, 96], sizes = [8, 32], strides = [1, 1]} : vector<8x128xf32> to vector<8x32xf32>
    %175 = arith.mulf %172, %130 : vector<8x32xf32>
    %176 = arith.mulf %171, %173 : vector<8x32xf32>
    %177 = arith.addf %175, %176 : vector<8x32xf32>
    %178 = math.tanh %177 : vector<8x32xf32>
    %179 = arith.mulf %174, %178 : vector<8x32xf32>
    %c0_71 = arith.constant 0 : index
    %c0_72 = arith.constant 0 : index
    %180 = vector.load %arg5[%c0_71, %c0_72] : memref<32x128xf32, #tpu.memory_space<vmem>>, vector<32x128xf32>
    %cst_73 = arith.constant dense<0.000000e+00> : vector<8x128xf32>
    %181 = tpu.matmul %179, %180, %cst_73 {dimension_numbers = #tpu.dot_dimension_numbers<[1], [0], [0], [1], [0, 0, 1, 1], [], []>} : vector<8x32xf32>, vector<32x128xf32>, vector<8x128xf32> -> vector<8x128xf32>
    %182 = arith.addf %158, %181 : vector<8x128xf32>
    %183 = arith.addf %182, %12 : vector<8x128xf32>
    %184 = arith.negf %183 : vector<8x128xf32>
    %185 = math.exp %184 : vector<8x128xf32>
    %cst_74 = arith.constant 1.000000e+00 : f32
    %186 = vector.broadcast %cst_74 : f32 to vector<8x128xf32>
    %187 = arith.addf %186, %185 : vector<8x128xf32>
    %188 = arith.divf %186, %187 : vector<8x128xf32>
    %189 = math.tanh %183 : vector<8x128xf32>
    %190 = vector.extract_strided_slice %188 {offsets = [0, 0], sizes = [8, 32], strides = [1, 1]} : vector<8x128xf32> to vector<8x32xf32>
    %191 = vector.extract_strided_slice %188 {offsets = [0, 32], sizes = [8, 32], strides = [1, 1]} : vector<8x128xf32> to vector<8x32xf32>
    %192 = vector.extract_strided_slice %189 {offsets = [0, 64], sizes = [8, 32], strides = [1, 1]} : vector<8x128xf32> to vector<8x32xf32>
    %193 = vector.extract_strided_slice %188 {offsets = [0, 96], sizes = [8, 32], strides = [1, 1]} : vector<8x128xf32> to vector<8x32xf32>
    %194 = arith.mulf %191, %149 : vector<8x32xf32>
    %195 = arith.mulf %190, %192 : vector<8x32xf32>
    %196 = arith.addf %194, %195 : vector<8x32xf32>
    %197 = math.tanh %196 : vector<8x32xf32>
    %198 = arith.mulf %193, %197 : vector<8x32xf32>
    %199 = arith.index_cast %c3_i32 : i32 to index
    %c0_75 = arith.constant 0 : index
    %c0_76 = arith.constant 0 : index
    %200 = vector.load %arg8[%199, %c0_75, %c0_76] : memref<8x32x128xf32, #tpu.memory_space<vmem>>, vector<1x32x128xf32>
    %201 = vector.shape_cast %200 : vector<1x32x128xf32> to vector<32x128xf32>
    %cst_77 = arith.constant dense<0.000000e+00> : vector<8x128xf32>
    %202 = tpu.matmul %198, %201, %cst_77 {dimension_numbers = #tpu.dot_dimension_numbers<[1], [0], [0], [1], [0, 0, 1, 1], [], []>} : vector<8x32xf32>, vector<32x128xf32>, vector<8x128xf32> -> vector<8x128xf32>
    %203 = arith.addf %156, %202 : vector<8x128xf32>
    %c4_i32 = arith.constant 4 : i32
    %c0_78 = arith.constant 0 : index
    %c0_79 = arith.constant 0 : index
    %204 = vector.load %arg6[%c0_78, %c0_79] : memref<32x128xf32, #tpu.memory_space<vmem>>, vector<32x128xf32>
    %cst_80 = arith.constant dense<0.000000e+00> : vector<8x128xf32>
    %205 = tpu.matmul %198, %204, %cst_80 {dimension_numbers = #tpu.dot_dimension_numbers<[1], [0], [0], [1], [0, 0, 1, 1], [], []>} : vector<8x32xf32>, vector<32x128xf32>, vector<8x128xf32> -> vector<8x128xf32>
    %206 = arith.index_cast %c4_i32 : i32 to index
    %c0_81 = arith.constant 0 : index
    %c0_82 = arith.constant 0 : index
    %207 = vector.load %arg11[%206, %c0_81, %c0_82] : memref<8x8x128xf32, #tpu.memory_space<vmem>>, vector<1x8x128xf32>
    %208 = vector.shape_cast %207 : vector<1x8x128xf32> to vector<8x128xf32>
    %c0_83 = arith.constant 0 : index
    %c0_84 = arith.constant 0 : index
    %209 = vector.load %arg3[%c0_83, %c0_84] : memref<32x128xf32, #tpu.memory_space<vmem>>, vector<32x128xf32>
    %cst_85 = arith.constant dense<0.000000e+00> : vector<8x128xf32>
    %210 = tpu.matmul %179, %209, %cst_85 {dimension_numbers = #tpu.dot_dimension_numbers<[1], [0], [0], [1], [0, 0, 1, 1], [], []>} : vector<8x32xf32>, vector<32x128xf32>, vector<8x128xf32> -> vector<8x128xf32>
    %211 = arith.addf %208, %210 : vector<8x128xf32>
    %212 = arith.negf %211 : vector<8x128xf32>
    %213 = math.exp %212 : vector<8x128xf32>
    %cst_86 = arith.constant 1.000000e+00 : f32
    %214 = vector.broadcast %cst_86 : f32 to vector<8x128xf32>
    %215 = arith.addf %214, %213 : vector<8x128xf32>
    %216 = arith.divf %214, %215 : vector<8x128xf32>
    %217 = math.tanh %211 : vector<8x128xf32>
    %218 = vector.extract_strided_slice %216 {offsets = [0, 0], sizes = [8, 32], strides = [1, 1]} : vector<8x128xf32> to vector<8x32xf32>
    %219 = vector.extract_strided_slice %216 {offsets = [0, 32], sizes = [8, 32], strides = [1, 1]} : vector<8x128xf32> to vector<8x32xf32>
    %220 = vector.extract_strided_slice %217 {offsets = [0, 64], sizes = [8, 32], strides = [1, 1]} : vector<8x128xf32> to vector<8x32xf32>
    %221 = vector.extract_strided_slice %216 {offsets = [0, 96], sizes = [8, 32], strides = [1, 1]} : vector<8x128xf32> to vector<8x32xf32>
    %222 = arith.mulf %219, %177 : vector<8x32xf32>
    %223 = arith.mulf %218, %220 : vector<8x32xf32>
    %224 = arith.addf %222, %223 : vector<8x32xf32>
    %225 = math.tanh %224 : vector<8x32xf32>
    %226 = arith.mulf %221, %225 : vector<8x32xf32>
    %c0_87 = arith.constant 0 : index
    %c0_88 = arith.constant 0 : index
    %227 = vector.load %arg5[%c0_87, %c0_88] : memref<32x128xf32, #tpu.memory_space<vmem>>, vector<32x128xf32>
    %cst_89 = arith.constant dense<0.000000e+00> : vector<8x128xf32>
    %228 = tpu.matmul %226, %227, %cst_89 {dimension_numbers = #tpu.dot_dimension_numbers<[1], [0], [0], [1], [0, 0, 1, 1], [], []>} : vector<8x32xf32>, vector<32x128xf32>, vector<8x128xf32> -> vector<8x128xf32>
    %229 = arith.addf %205, %228 : vector<8x128xf32>
    %230 = arith.addf %229, %12 : vector<8x128xf32>
    %231 = arith.negf %230 : vector<8x128xf32>
    %232 = math.exp %231 : vector<8x128xf32>
    %cst_90 = arith.constant 1.000000e+00 : f32
    %233 = vector.broadcast %cst_90 : f32 to vector<8x128xf32>
    %234 = arith.addf %233, %232 : vector<8x128xf32>
    %235 = arith.divf %233, %234 : vector<8x128xf32>
    %236 = math.tanh %230 : vector<8x128xf32>
    %237 = vector.extract_strided_slice %235 {offsets = [0, 0], sizes = [8, 32], strides = [1, 1]} : vector<8x128xf32> to vector<8x32xf32>
    %238 = vector.extract_strided_slice %235 {offsets = [0, 32], sizes = [8, 32], strides = [1, 1]} : vector<8x128xf32> to vector<8x32xf32>
    %239 = vector.extract_strided_slice %236 {offsets = [0, 64], sizes = [8, 32], strides = [1, 1]} : vector<8x128xf32> to vector<8x32xf32>
    %240 = vector.extract_strided_slice %235 {offsets = [0, 96], sizes = [8, 32], strides = [1, 1]} : vector<8x128xf32> to vector<8x32xf32>
    %241 = arith.mulf %238, %196 : vector<8x32xf32>
    %242 = arith.mulf %237, %239 : vector<8x32xf32>
    %243 = arith.addf %241, %242 : vector<8x32xf32>
    %244 = math.tanh %243 : vector<8x32xf32>
    %245 = arith.mulf %240, %244 : vector<8x32xf32>
    %246 = arith.index_cast %c4_i32 : i32 to index
    %c0_91 = arith.constant 0 : index
    %c0_92 = arith.constant 0 : index
    %247 = vector.load %arg8[%246, %c0_91, %c0_92] : memref<8x32x128xf32, #tpu.memory_space<vmem>>, vector<1x32x128xf32>
    %248 = vector.shape_cast %247 : vector<1x32x128xf32> to vector<32x128xf32>
    %cst_93 = arith.constant dense<0.000000e+00> : vector<8x128xf32>
    %249 = tpu.matmul %245, %248, %cst_93 {dimension_numbers = #tpu.dot_dimension_numbers<[1], [0], [0], [1], [0, 0, 1, 1], [], []>} : vector<8x32xf32>, vector<32x128xf32>, vector<8x128xf32> -> vector<8x128xf32>
    %250 = arith.addf %203, %249 : vector<8x128xf32>
    %c5_i32 = arith.constant 5 : i32
    %c0_94 = arith.constant 0 : index
    %c0_95 = arith.constant 0 : index
    %251 = vector.load %arg6[%c0_94, %c0_95] : memref<32x128xf32, #tpu.memory_space<vmem>>, vector<32x128xf32>
    %cst_96 = arith.constant dense<0.000000e+00> : vector<8x128xf32>
    %252 = tpu.matmul %245, %251, %cst_96 {dimension_numbers = #tpu.dot_dimension_numbers<[1], [0], [0], [1], [0, 0, 1, 1], [], []>} : vector<8x32xf32>, vector<32x128xf32>, vector<8x128xf32> -> vector<8x128xf32>
    %253 = arith.index_cast %c5_i32 : i32 to index
    %c0_97 = arith.constant 0 : index
    %c0_98 = arith.constant 0 : index
    %254 = vector.load %arg11[%253, %c0_97, %c0_98] : memref<8x8x128xf32, #tpu.memory_space<vmem>>, vector<1x8x128xf32>
    %255 = vector.shape_cast %254 : vector<1x8x128xf32> to vector<8x128xf32>
    %c0_99 = arith.constant 0 : index
    %c0_100 = arith.constant 0 : index
    %256 = vector.load %arg3[%c0_99, %c0_100] : memref<32x128xf32, #tpu.memory_space<vmem>>, vector<32x128xf32>
    %cst_101 = arith.constant dense<0.000000e+00> : vector<8x128xf32>
    %257 = tpu.matmul %226, %256, %cst_101 {dimension_numbers = #tpu.dot_dimension_numbers<[1], [0], [0], [1], [0, 0, 1, 1], [], []>} : vector<8x32xf32>, vector<32x128xf32>, vector<8x128xf32> -> vector<8x128xf32>
    %258 = arith.addf %255, %257 : vector<8x128xf32>
    %259 = arith.negf %258 : vector<8x128xf32>
    %260 = math.exp %259 : vector<8x128xf32>
    %cst_102 = arith.constant 1.000000e+00 : f32
    %261 = vector.broadcast %cst_102 : f32 to vector<8x128xf32>
    %262 = arith.addf %261, %260 : vector<8x128xf32>
    %263 = arith.divf %261, %262 : vector<8x128xf32>
    %264 = math.tanh %258 : vector<8x128xf32>
    %265 = vector.extract_strided_slice %263 {offsets = [0, 0], sizes = [8, 32], strides = [1, 1]} : vector<8x128xf32> to vector<8x32xf32>
    %266 = vector.extract_strided_slice %263 {offsets = [0, 32], sizes = [8, 32], strides = [1, 1]} : vector<8x128xf32> to vector<8x32xf32>
    %267 = vector.extract_strided_slice %264 {offsets = [0, 64], sizes = [8, 32], strides = [1, 1]} : vector<8x128xf32> to vector<8x32xf32>
    %268 = vector.extract_strided_slice %263 {offsets = [0, 96], sizes = [8, 32], strides = [1, 1]} : vector<8x128xf32> to vector<8x32xf32>
    %269 = arith.mulf %266, %224 : vector<8x32xf32>
    %270 = arith.mulf %265, %267 : vector<8x32xf32>
    %271 = arith.addf %269, %270 : vector<8x32xf32>
    %272 = math.tanh %271 : vector<8x32xf32>
    %273 = arith.mulf %268, %272 : vector<8x32xf32>
    %c0_103 = arith.constant 0 : index
    %c0_104 = arith.constant 0 : index
    %274 = vector.load %arg5[%c0_103, %c0_104] : memref<32x128xf32, #tpu.memory_space<vmem>>, vector<32x128xf32>
    %cst_105 = arith.constant dense<0.000000e+00> : vector<8x128xf32>
    %275 = tpu.matmul %273, %274, %cst_105 {dimension_numbers = #tpu.dot_dimension_numbers<[1], [0], [0], [1], [0, 0, 1, 1], [], []>} : vector<8x32xf32>, vector<32x128xf32>, vector<8x128xf32> -> vector<8x128xf32>
    %276 = arith.addf %252, %275 : vector<8x128xf32>
    %277 = arith.addf %276, %12 : vector<8x128xf32>
    %278 = arith.negf %277 : vector<8x128xf32>
    %279 = math.exp %278 : vector<8x128xf32>
    %cst_106 = arith.constant 1.000000e+00 : f32
    %280 = vector.broadcast %cst_106 : f32 to vector<8x128xf32>
    %281 = arith.addf %280, %279 : vector<8x128xf32>
    %282 = arith.divf %280, %281 : vector<8x128xf32>
    %283 = math.tanh %277 : vector<8x128xf32>
    %284 = vector.extract_strided_slice %282 {offsets = [0, 0], sizes = [8, 32], strides = [1, 1]} : vector<8x128xf32> to vector<8x32xf32>
    %285 = vector.extract_strided_slice %282 {offsets = [0, 32], sizes = [8, 32], strides = [1, 1]} : vector<8x128xf32> to vector<8x32xf32>
    %286 = vector.extract_strided_slice %283 {offsets = [0, 64], sizes = [8, 32], strides = [1, 1]} : vector<8x128xf32> to vector<8x32xf32>
    %287 = vector.extract_strided_slice %282 {offsets = [0, 96], sizes = [8, 32], strides = [1, 1]} : vector<8x128xf32> to vector<8x32xf32>
    %288 = arith.mulf %285, %243 : vector<8x32xf32>
    %289 = arith.mulf %284, %286 : vector<8x32xf32>
    %290 = arith.addf %288, %289 : vector<8x32xf32>
    %291 = math.tanh %290 : vector<8x32xf32>
    %292 = arith.mulf %287, %291 : vector<8x32xf32>
    %293 = arith.index_cast %c5_i32 : i32 to index
    %c0_107 = arith.constant 0 : index
    %c0_108 = arith.constant 0 : index
    %294 = vector.load %arg8[%293, %c0_107, %c0_108] : memref<8x32x128xf32, #tpu.memory_space<vmem>>, vector<1x32x128xf32>
    %295 = vector.shape_cast %294 : vector<1x32x128xf32> to vector<32x128xf32>
    %cst_109 = arith.constant dense<0.000000e+00> : vector<8x128xf32>
    %296 = tpu.matmul %292, %295, %cst_109 {dimension_numbers = #tpu.dot_dimension_numbers<[1], [0], [0], [1], [0, 0, 1, 1], [], []>} : vector<8x32xf32>, vector<32x128xf32>, vector<8x128xf32> -> vector<8x128xf32>
    %297 = arith.addf %250, %296 : vector<8x128xf32>
    %c6_i32 = arith.constant 6 : i32
    %c0_110 = arith.constant 0 : index
    %c0_111 = arith.constant 0 : index
    %298 = vector.load %arg6[%c0_110, %c0_111] : memref<32x128xf32, #tpu.memory_space<vmem>>, vector<32x128xf32>
    %cst_112 = arith.constant dense<0.000000e+00> : vector<8x128xf32>
    %299 = tpu.matmul %292, %298, %cst_112 {dimension_numbers = #tpu.dot_dimension_numbers<[1], [0], [0], [1], [0, 0, 1, 1], [], []>} : vector<8x32xf32>, vector<32x128xf32>, vector<8x128xf32> -> vector<8x128xf32>
    %300 = arith.index_cast %c6_i32 : i32 to index
    %c0_113 = arith.constant 0 : index
    %c0_114 = arith.constant 0 : index
    %301 = vector.load %arg11[%300, %c0_113, %c0_114] : memref<8x8x128xf32, #tpu.memory_space<vmem>>, vector<1x8x128xf32>
    %302 = vector.shape_cast %301 : vector<1x8x128xf32> to vector<8x128xf32>
    %c0_115 = arith.constant 0 : index
    %c0_116 = arith.constant 0 : index
    %303 = vector.load %arg3[%c0_115, %c0_116] : memref<32x128xf32, #tpu.memory_space<vmem>>, vector<32x128xf32>
    %cst_117 = arith.constant dense<0.000000e+00> : vector<8x128xf32>
    %304 = tpu.matmul %273, %303, %cst_117 {dimension_numbers = #tpu.dot_dimension_numbers<[1], [0], [0], [1], [0, 0, 1, 1], [], []>} : vector<8x32xf32>, vector<32x128xf32>, vector<8x128xf32> -> vector<8x128xf32>
    %305 = arith.addf %302, %304 : vector<8x128xf32>
    %306 = arith.negf %305 : vector<8x128xf32>
    %307 = math.exp %306 : vector<8x128xf32>
    %cst_118 = arith.constant 1.000000e+00 : f32
    %308 = vector.broadcast %cst_118 : f32 to vector<8x128xf32>
    %309 = arith.addf %308, %307 : vector<8x128xf32>
    %310 = arith.divf %308, %309 : vector<8x128xf32>
    %311 = math.tanh %305 : vector<8x128xf32>
    %312 = vector.extract_strided_slice %310 {offsets = [0, 0], sizes = [8, 32], strides = [1, 1]} : vector<8x128xf32> to vector<8x32xf32>
    %313 = vector.extract_strided_slice %310 {offsets = [0, 32], sizes = [8, 32], strides = [1, 1]} : vector<8x128xf32> to vector<8x32xf32>
    %314 = vector.extract_strided_slice %311 {offsets = [0, 64], sizes = [8, 32], strides = [1, 1]} : vector<8x128xf32> to vector<8x32xf32>
    %315 = vector.extract_strided_slice %310 {offsets = [0, 96], sizes = [8, 32], strides = [1, 1]} : vector<8x128xf32> to vector<8x32xf32>
    %316 = arith.mulf %313, %271 : vector<8x32xf32>
    %317 = arith.mulf %312, %314 : vector<8x32xf32>
    %318 = arith.addf %316, %317 : vector<8x32xf32>
    %319 = math.tanh %318 : vector<8x32xf32>
    %320 = arith.mulf %315, %319 : vector<8x32xf32>
    %c0_119 = arith.constant 0 : index
    %c0_120 = arith.constant 0 : index
    %321 = vector.load %arg5[%c0_119, %c0_120] : memref<32x128xf32, #tpu.memory_space<vmem>>, vector<32x128xf32>
    %cst_121 = arith.constant dense<0.000000e+00> : vector<8x128xf32>
    %322 = tpu.matmul %320, %321, %cst_121 {dimension_numbers = #tpu.dot_dimension_numbers<[1], [0], [0], [1], [0, 0, 1, 1], [], []>} : vector<8x32xf32>, vector<32x128xf32>, vector<8x128xf32> -> vector<8x128xf32>
    %323 = arith.addf %299, %322 : vector<8x128xf32>
    %324 = arith.addf %323, %12 : vector<8x128xf32>
    %325 = arith.negf %324 : vector<8x128xf32>
    %326 = math.exp %325 : vector<8x128xf32>
    %cst_122 = arith.constant 1.000000e+00 : f32
    %327 = vector.broadcast %cst_122 : f32 to vector<8x128xf32>
    %328 = arith.addf %327, %326 : vector<8x128xf32>
    %329 = arith.divf %327, %328 : vector<8x128xf32>
    %330 = math.tanh %324 : vector<8x128xf32>
    %331 = vector.extract_strided_slice %329 {offsets = [0, 0], sizes = [8, 32], strides = [1, 1]} : vector<8x128xf32> to vector<8x32xf32>
    %332 = vector.extract_strided_slice %329 {offsets = [0, 32], sizes = [8, 32], strides = [1, 1]} : vector<8x128xf32> to vector<8x32xf32>
    %333 = vector.extract_strided_slice %330 {offsets = [0, 64], sizes = [8, 32], strides = [1, 1]} : vector<8x128xf32> to vector<8x32xf32>
    %334 = vector.extract_strided_slice %329 {offsets = [0, 96], sizes = [8, 32], strides = [1, 1]} : vector<8x128xf32> to vector<8x32xf32>
    %335 = arith.mulf %332, %290 : vector<8x32xf32>
    %336 = arith.mulf %331, %333 : vector<8x32xf32>
    %337 = arith.addf %335, %336 : vector<8x32xf32>
    %338 = math.tanh %337 : vector<8x32xf32>
    %339 = arith.mulf %334, %338 : vector<8x32xf32>
    %340 = arith.index_cast %c6_i32 : i32 to index
    %c0_123 = arith.constant 0 : index
    %c0_124 = arith.constant 0 : index
    %341 = vector.load %arg8[%340, %c0_123, %c0_124] : memref<8x32x128xf32, #tpu.memory_space<vmem>>, vector<1x32x128xf32>
    %342 = vector.shape_cast %341 : vector<1x32x128xf32> to vector<32x128xf32>
    %cst_125 = arith.constant dense<0.000000e+00> : vector<8x128xf32>
    %343 = tpu.matmul %339, %342, %cst_125 {dimension_numbers = #tpu.dot_dimension_numbers<[1], [0], [0], [1], [0, 0, 1, 1], [], []>} : vector<8x32xf32>, vector<32x128xf32>, vector<8x128xf32> -> vector<8x128xf32>
    %344 = arith.addf %297, %343 : vector<8x128xf32>
    %c7_i32 = arith.constant 7 : i32
    %c0_126 = arith.constant 0 : index
    %c0_127 = arith.constant 0 : index
    %345 = vector.load %arg6[%c0_126, %c0_127] : memref<32x128xf32, #tpu.memory_space<vmem>>, vector<32x128xf32>
    %cst_128 = arith.constant dense<0.000000e+00> : vector<8x128xf32>
    %346 = tpu.matmul %339, %345, %cst_128 {dimension_numbers = #tpu.dot_dimension_numbers<[1], [0], [0], [1], [0, 0, 1, 1], [], []>} : vector<8x32xf32>, vector<32x128xf32>, vector<8x128xf32> -> vector<8x128xf32>
    %347 = arith.index_cast %c7_i32 : i32 to index
    %c0_129 = arith.constant 0 : index
    %c0_130 = arith.constant 0 : index
    %348 = vector.load %arg11[%347, %c0_129, %c0_130] : memref<8x8x128xf32, #tpu.memory_space<vmem>>, vector<1x8x128xf32>
    %349 = vector.shape_cast %348 : vector<1x8x128xf32> to vector<8x128xf32>
    %c0_131 = arith.constant 0 : index
    %c0_132 = arith.constant 0 : index
    %350 = vector.load %arg3[%c0_131, %c0_132] : memref<32x128xf32, #tpu.memory_space<vmem>>, vector<32x128xf32>
    %cst_133 = arith.constant dense<0.000000e+00> : vector<8x128xf32>
    %351 = tpu.matmul %320, %350, %cst_133 {dimension_numbers = #tpu.dot_dimension_numbers<[1], [0], [0], [1], [0, 0, 1, 1], [], []>} : vector<8x32xf32>, vector<32x128xf32>, vector<8x128xf32> -> vector<8x128xf32>
    %352 = arith.addf %349, %351 : vector<8x128xf32>
    %353 = arith.negf %352 : vector<8x128xf32>
    %354 = math.exp %353 : vector<8x128xf32>
    %cst_134 = arith.constant 1.000000e+00 : f32
    %355 = vector.broadcast %cst_134 : f32 to vector<8x128xf32>
    %356 = arith.addf %355, %354 : vector<8x128xf32>
    %357 = arith.divf %355, %356 : vector<8x128xf32>
    %358 = math.tanh %352 : vector<8x128xf32>
    %359 = vector.extract_strided_slice %357 {offsets = [0, 0], sizes = [8, 32], strides = [1, 1]} : vector<8x128xf32> to vector<8x32xf32>
    %360 = vector.extract_strided_slice %357 {offsets = [0, 32], sizes = [8, 32], strides = [1, 1]} : vector<8x128xf32> to vector<8x32xf32>
    %361 = vector.extract_strided_slice %358 {offsets = [0, 64], sizes = [8, 32], strides = [1, 1]} : vector<8x128xf32> to vector<8x32xf32>
    %362 = vector.extract_strided_slice %357 {offsets = [0, 96], sizes = [8, 32], strides = [1, 1]} : vector<8x128xf32> to vector<8x32xf32>
    %363 = arith.mulf %360, %318 : vector<8x32xf32>
    %364 = arith.mulf %359, %361 : vector<8x32xf32>
    %365 = arith.addf %363, %364 : vector<8x32xf32>
    %366 = math.tanh %365 : vector<8x32xf32>
    %367 = arith.mulf %362, %366 : vector<8x32xf32>
    %c0_135 = arith.constant 0 : index
    %c0_136 = arith.constant 0 : index
    %368 = vector.load %arg5[%c0_135, %c0_136] : memref<32x128xf32, #tpu.memory_space<vmem>>, vector<32x128xf32>
    %cst_137 = arith.constant dense<0.000000e+00> : vector<8x128xf32>
    %369 = tpu.matmul %367, %368, %cst_137 {dimension_numbers = #tpu.dot_dimension_numbers<[1], [0], [0], [1], [0, 0, 1, 1], [], []>} : vector<8x32xf32>, vector<32x128xf32>, vector<8x128xf32> -> vector<8x128xf32>
    %370 = arith.addf %346, %369 : vector<8x128xf32>
    %371 = arith.addf %370, %12 : vector<8x128xf32>
    %372 = arith.negf %371 : vector<8x128xf32>
    %373 = math.exp %372 : vector<8x128xf32>
    %cst_138 = arith.constant 1.000000e+00 : f32
    %374 = vector.broadcast %cst_138 : f32 to vector<8x128xf32>
    %375 = arith.addf %374, %373 : vector<8x128xf32>
    %376 = arith.divf %374, %375 : vector<8x128xf32>
    %377 = math.tanh %371 : vector<8x128xf32>
    %378 = vector.extract_strided_slice %376 {offsets = [0, 0], sizes = [8, 32], strides = [1, 1]} : vector<8x128xf32> to vector<8x32xf32>
    %379 = vector.extract_strided_slice %376 {offsets = [0, 32], sizes = [8, 32], strides = [1, 1]} : vector<8x128xf32> to vector<8x32xf32>
    %380 = vector.extract_strided_slice %377 {offsets = [0, 64], sizes = [8, 32], strides = [1, 1]} : vector<8x128xf32> to vector<8x32xf32>
    %381 = vector.extract_strided_slice %376 {offsets = [0, 96], sizes = [8, 32], strides = [1, 1]} : vector<8x128xf32> to vector<8x32xf32>
    %382 = arith.mulf %379, %337 : vector<8x32xf32>
    %383 = arith.mulf %378, %380 : vector<8x32xf32>
    %384 = arith.addf %382, %383 : vector<8x32xf32>
    %385 = math.tanh %384 : vector<8x32xf32>
    %386 = arith.mulf %381, %385 : vector<8x32xf32>
    %387 = arith.index_cast %c7_i32 : i32 to index
    %c0_139 = arith.constant 0 : index
    %c0_140 = arith.constant 0 : index
    %388 = vector.load %arg8[%387, %c0_139, %c0_140] : memref<8x32x128xf32, #tpu.memory_space<vmem>>, vector<1x32x128xf32>
    %389 = vector.shape_cast %388 : vector<1x32x128xf32> to vector<32x128xf32>
    %cst_141 = arith.constant dense<0.000000e+00> : vector<8x128xf32>
    %390 = tpu.matmul %386, %389, %cst_141 {dimension_numbers = #tpu.dot_dimension_numbers<[1], [0], [0], [1], [0, 0, 1, 1], [], []>} : vector<8x32xf32>, vector<32x128xf32>, vector<8x128xf32> -> vector<8x128xf32>
    %391 = arith.addf %344, %390 : vector<8x128xf32>
    %c8_i32 = arith.constant 8 : i32
    %c0_142 = arith.constant 0 : index
    %c0_143 = arith.constant 0 : index
    %392 = vector.load %arg9[%c0_142, %c0_143] : memref<1x128xf32, #tpu.memory_space<vmem>>, vector<1x128xf32>
    %393 = vector.broadcast %392 : vector<1x128xf32> to vector<8x128xf32>
    %394 = arith.addf %391, %393 : vector<8x128xf32>
    %c0_144 = arith.constant 0 : index
    %c0_145 = arith.constant 0 : index
    %395 = vector.load %arg10[%c0_144, %c0_145] : memref<8x128xf32, #tpu.memory_space<vmem>>, vector<8x128xf32>
    tpu.vector_store %arg10[%c0_144, %c0_145], %394 {strides = array<i32>} : memref<8x128xf32, #tpu.memory_space<vmem>>, vector<8x128xf32>,
    return
  }
  func.func @transform_0(%arg0: i32) -> (i32, i32, i32) {
    %c0_i32 = arith.constant 0 : i32
    %c0_i32_0 = arith.constant 0 : i32
    %c0_i32_1 = arith.constant 0 : i32
    return %c0_i32, %arg0, %c0_i32_0 : i32, i32, i32
  }
  func.func @transform_1(%arg0: i32) -> (i32, i32) {
    %c0_i32 = arith.constant 0 : i32
    %c0_i32_0 = arith.constant 0 : i32
    %c0_i32_1 = arith.constant 0 : i32
    return %c0_i32, %c0_i32_0 : i32, i32
  }
  func.func @transform_2(%arg0: i32) -> (i32, i32) {
    %c0_i32 = arith.constant 0 : i32
    %c0_i32_0 = arith.constant 0 : i32
    %c0_i32_1 = arith.constant 0 : i32
    return %c0_i32, %c0_i32_0 : i32, i32
  }
  func.func @transform_3(%arg0: i32) -> (i32, i32) {
    %c0_i32 = arith.constant 0 : i32
    %c0_i32_0 = arith.constant 0 : i32
    %c0_i32_1 = arith.constant 0 : i32
    return %c0_i32, %c0_i32_0 : i32, i32
  }
  func.func @transform_4(%arg0: i32) -> (i32, i32) {
    %c0_i32 = arith.constant 0 : i32
    %c0_i32_0 = arith.constant 0 : i32
    %c0_i32_1 = arith.constant 0 : i32
    return %c0_i32, %c0_i32_0 : i32, i32
  }
  func.func @transform_5(%arg0: i32) -> (i32, i32) {
    %c0_i32 = arith.constant 0 : i32
    %c0_i32_0 = arith.constant 0 : i32
    %c0_i32_1 = arith.constant 0 : i32
    return %c0_i32, %c0_i32_0 : i32, i32
  }
  func.func @transform_6(%arg0: i32) -> (i32, i32) {
    %c0_i32 = arith.constant 0 : i32
    %c0_i32_0 = arith.constant 0 : i32
    %c0_i32_1 = arith.constant 0 : i32
    return %c0_i32, %c0_i32_0 : i32, i32
  }
  func.func @transform_7(%arg0: i32) -> (i32, i32, i32) {
    %c0_i32 = arith.constant 0 : i32
    %c0_i32_0 = arith.constant 0 : i32
    %c0_i32_1 = arith.constant 0 : i32
    %c0_i32_2 = arith.constant 0 : i32
    return %c0_i32, %c0_i32_0, %c0_i32_1 : i32, i32, i32
  }
  func.func @transform_8(%arg0: i32) -> (i32, i32) {
    %c0_i32 = arith.constant 0 : i32
    %c0_i32_0 = arith.constant 0 : i32
    %c0_i32_1 = arith.constant 0 : i32
    return %c0_i32, %c0_i32_0 : i32, i32
  }
  func.func @transform_9(%arg0: i32) -> (i32, i32) {
    %c0_i32 = arith.constant 0 : i32
    %c0_i32_0 = arith.constant 0 : i32
    return %arg0, %c0_i32 : i32, i32
  }
}

</mosaic_0001>

<bundles_post_ra>
// kernel: tpu_custom_call.1
= control target key start
LH: loop header
LB: loop body
LE: loop exit
PB: predicated region body
PF: predicated region fallthrough
CT: control target
= control target key end

     0   :  { %14 = vsyncpa [#allocation4], 0  ;;  %s4680_s0 = inlined_call_operand.hbm [shape: f32[8,8,16], index: 0, kind: input, shape index: {}]   ;;  %s4681_s1 = inlined_call_operand.hbm [shape: f32[16,128], index: 1, kind: input, shape index: {}]   ;;  %s4682_s2 = inlined_call_operand.hbm [shape: f32[32,128], index: 2, kind: input, shape index: {}]   ;;  %s4683_s3 = inlined_call_operand.vmem [shape: f32[1,128], index: 3, kind: input, shape index: {}]   ;;  %s4684_s4 = inlined_call_operand.hbm [shape: f32[32,128], index: 4, kind: input, shape index: {}]   ;;  %s4685_s5 = inlined_call_operand.hbm [shape: f32[32,128], index: 5, kind: input, shape index: {}]   ;;  %s4686_s6 = inlined_call_operand.vmem [shape: f32[1,128], index: 6, kind: input, shape index: {}]   ;;  %s4687_s7 = inlined_call_operand.hbm [shape: f32[8,32,128], index: 7, kind: input, shape index: {}]   ;;  %s4688_s8 = inlined_call_operand.vmem [shape: f32[1,128], index: 8, kind: input, shape index: {}]   ;;  %s4689_s9 = inlined_call_operand.hbm [shape: f32[8,128], index: 9, kind: output, shape index: {}]  }
   0x1   :  { %15 = vsyncpa [#allocation7], 0 }
   0x2   :  { %16 = vsyncpa [#allocation10], 0 }
   0x3   :  { %17 = vsyncpa [#allocation13], 0 }
   0x4   :  { %18 = vsyncpa [#allocation5], 0  ;;  %s4008_s30 = smov [#allocation6]   ;;  %s4009_s11 = smov [#allocation9]  }
   0x5   :  { %s36_s10 = sshll.u32 %s4008_s30, 4  ;;  %s62_s12 = sshll.u32 %s4009_s11, 4  ;;  %s37_s10 = int_to_ptr.vmem [resolvable:$true] %s36_s10  ;;  %s63_s12 = int_to_ptr.vmem [resolvable:$true] %s62_s12 }
   0x6   :  { %s3866_s13 = scalar_lea.vmem %s37_s10, 256  ;;  %p3871_p1 = scmp.lt.s32.totalorder %s37_s10, %s37_s10 }
   0x7   :  { %p3867_p0 = scmp.ne.s32.totalorder %s37_s10, %s3866_s13  ;;  %p3872_p2 = scmp.lt.s32.totalorder %s3866_s13, %s3866_s13 }
   0x9   :  { %p3873_p3 = por %p3872_p2, %p3871_p1 }
   0xb   :  { %p3874_p4 = pnand %p3873_p3, %p3867_p0 }
   0xd   :  { %3877 = shalt.err (!%p3874_p4)
}
   0xe   :  { %s4010_s14 = smov 128   ;;  %s4011_s15 = smov 8  }
   0xf   :  { %42 = dma.hbm_to_vmem [thread:$0]  %s4681_s1, 256, %s37_s10, [#allocation7], %s4010_s14, %s4010_s14, %s4011_s15  }
  0x10   :  { %s3886_s18 = scalar_lea.vmem %s63_s12, 512  ;;  %p3891_p6 = scmp.lt.s32.totalorder %s63_s12, %s63_s12 }
  0x11   :  { %p3887_p5 = scmp.ne.s32.totalorder %s63_s12, %s3886_s18  ;;  %p3892_p7 = scmp.lt.s32.totalorder %s3886_s18, %s3886_s18 }
  0x13   :  { %p3893_p8 = por %p3892_p7, %p3891_p6 }
  0x15   :  { %p3894_p9 = pnand %p3893_p8, %p3887_p5 }
  0x17   :  { %3897 = shalt.err (!%p3894_p9)
}
  0x18   :  { %68 = dma.hbm_to_vmem [thread:$0]  %s4684_s4, 512, %s63_s12, [#allocation10], %s4010_s14, %s4010_s14, %s4011_s15  }
  0x19   :  { %s4012_s21 = smov [#allocation3]   ;;  %s4013_s23 = smov [#allocation8]  }
  0x1a   :  { %s24_s22 = sshll.u32 %s4012_s21, 4  ;;  %s48_s24 = sshll.u32 %s4013_s23, 4  ;;  %s25_s22 = int_to_ptr.vmem [resolvable:$true] %s24_s22  ;;  %s49_s24 = int_to_ptr.vmem [resolvable:$true] %s48_s24 }
  0x1b   :  { %s3906_s1 = scalar_lea.vmem %s25_s22, 1024  ;;  %p3911_p11 = scmp.lt.s32.totalorder %s25_s22, %s25_s22 }
  0x1c   :  { %p3907_p10 = scmp.ne.s32.totalorder %s25_s22, %s3906_s1  ;;  %p3912_p12 = scmp.lt.s32.totalorder %s3906_s1, %s3906_s1 }
  0x1e   :  { %p3913_p13 = por %p3912_p12, %p3911_p11 }
  0x20   :  { %p3914_p0 = pnand %p3913_p13, %p3907_p10 }
  0x22   :  { %3917 = shalt.err (!%p3914_p0)
}
  0x23   :  { %30 = dma.hbm_to_vmem [thread:$0]  %s4680_s0, 1024, %s25_s22, [#allocation4], %s4010_s14, %s4010_s14, %s4011_s15  }
  0x24   :  { %s3926_s4 = scalar_lea.vmem %s49_s24, 512  ;;  %p3931_p2 = scmp.lt.s32.totalorder %s49_s24, %s49_s24 }
  0x25   :  { %p3927_p1 = scmp.ne.s32.totalorder %s49_s24, %s3926_s4  ;;  %p3932_p3 = scmp.lt.s32.totalorder %s3926_s4, %s3926_s4 }
  0x27   :  { %p3933_p4 = por %p3932_p3, %p3931_p2 }
  0x29   :  { %p3934_p5 = pnand %p3933_p4, %p3927_p1 }
  0x2b   :  { %3937 = shalt.err (!%p3934_p5)
}
  0x2c   :  { %54 = dma.hbm_to_vmem [thread:$0]  %s4682_s2, 512, %s49_s24, [#allocation7], %s4010_s14, %s4010_s14, %s4011_s15  }
  0x2d   :  { %s4014_s29 = smov [#allocation11]   ;;  %s4015_s10 = smov [#allocation12]  }
  0x2e   :  { %s74_s30 = sshll.u32 %s4014_s29, 4  ;;  %s88_s11 = sshll.u32 %s4015_s10, 4  ;;  %s75_s30 = int_to_ptr.vmem [resolvable:$true] %s74_s30  ;;  %s89_s11 = int_to_ptr.vmem [resolvable:$true] %s88_s11 }
  0x2f   :  { %s3946_s0 = scalar_lea.vmem %s75_s30, 512  ;;  %p3951_p7 = scmp.lt.s32.totalorder %s75_s30, %s75_s30 }
  0x30   :  { %p3947_p6 = scmp.ne.s32.totalorder %s75_s30, %s3946_s0  ;;  %p3952_p8 = scmp.lt.s32.totalorder %s3946_s0, %s3946_s0 }
  0x32   :  { %p3953_p9 = por %p3952_p8, %p3951_p7 }
  0x34   :  { %p3954_p10 = pnand %p3953_p9, %p3947_p6 }
  0x36   :  { %3957 = shalt.err (!%p3954_p10)
}
  0x37   :  { %80 = dma.hbm_to_vmem [thread:$0]  %s4685_s5, 512, %s75_s30, [#allocation10], %s4010_s14, %s4010_s14, %s4011_s15  }
  0x38   :  { %s3966_s2 = scalar_lea.vmem %s89_s11, 4096  ;;  %p3971_p12 = scmp.lt.s32.totalorder %s89_s11, %s89_s11 }
  0x39   :  { %p3967_p11 = scmp.ne.s32.totalorder %s89_s11, %s3966_s2  ;;  %p3972_p13 = scmp.lt.s32.totalorder %s3966_s2, %s3966_s2 }
  0x3b   :  { %p3973_p0 = por %p3972_p13, %p3971_p12 }
  0x3d   :  { %p3974_p1 = pnand %p3973_p0, %p3967_p11 }
  0x3f   :  { %3977 = shalt.err (!%p3974_p1)
}
  0x40   :  { %94 = dma.hbm_to_vmem [thread:$0]  %s4687_s7, 4096, %s89_s11, [#allocation13], %s4010_s14, %s4010_s14, %s4011_s15  }
  0x41   :  { %3998 = dma.done.wait [#allocation4], 1024  }
  0x42   :  { %3999 = vsyncadd [#allocation4], 4294966272 }
  0x43   :  { %4000 = dma.done.wait [#allocation7], 768  }
  0x44   :  { %4001 = vsyncadd [#allocation7], 4294966528 }
  0x45   :  { %4002 = dma.done.wait [#allocation10], 1024  }
  0x46   :  { %4003 = vsyncadd [#allocation10], 4294966272 }
  0x47   :  { %4004 = dma.done.wait [#allocation13], 4096  }
  0x48   :  { %4005 = vsyncadd [#allocation13], 4294963200  ;;  %v4016_v0 = vmov 0.0   ;;  %vm4017_vm0 = vmmov 0   ;;  %v124_v1 = vld [vmem:[#allocation6 + $0x8] sm:$0xff]  ;;  %v123_v3 = vld [vmem:[#allocation6] sm:$0xff] }
  0x49   :  { %3351 = vmatprep.subr.mxu1 %v4016_v0  ;;  %3359 = vmatprep.mubr.msk.f32.mxu1 %vm4017_vm0, %v4016_v0  ;;  %v4110_v2 = vld [vmem:[#allocation8 + $0x18] sm:$0xff]  ;;  %v4113_v4 = vld [vmem:[#allocation8 + $0x10] sm:$0xff]  ;;  %vm125_vm1 = vcmask 130048   ;;  %v4117_v7 = vld [vmem:[#allocation8 + $0x8] sm:$0xff]  ;;  %s4018_s14 = smov 64   ;;  %s4019_s15 = smov 32  }
  0x4a   :  { %3335 = vmatprep.subr.mxu0 %v124_v1  ;;  %3352 = vmatpush3.msra.mxu1 %v4110_v2  ;;  %v115_v5 = vld [vmem:[#allocation3] sm:$0xff]  ;;  %v116_v6 = vld [vmem:[#allocation3 + $0x8] sm:$0xff]  ;;  %v4122_v8 = vld [vmem:[#allocation8] sm:$0xff]  ;;  %vm294_vm2 = vcmask 261120   ;;  %s4020_s24 = smov [#allocation14]  }
  0x4b   :  { %3336 = vmatpush3.msra.mxu0 %v124_v1  ;;  %3353 = vmatprep.subr.mxu1 %v4016_v0  ;;  %v4137_v10 = vld [vmem:[%s4683_s3] ss:$0 sm:$0xff]  ;;  %v117_v26 = vld [vmem:[#allocation3 + $0x10] sm:$0xff]  ;;  %v118_v27 = vld [vmem:[#allocation3 + $0x18] sm:$0xff]  ;;  %s3096_s1 = sshll.u32 %s4020_s24, 4  ;;  %s3097_s1 = int_to_ptr.vmem [resolvable:$true] %s3096_s1 }
  0x4c   :  { %3337 = vmatprep.subr.mxu0 %v123_v3  ;;  %3354 = vmatpush3.msra.mxu1 %v4113_v4  ;;  %v4145_v28 = vld [vmem:[#allocation11 + $0x18] sm:$0xff]  ;;  %v119_v29 = vld [vmem:[#allocation3 + $0x20] sm:$0xff]  ;;  %v121_v34 = vld [vmem:[#allocation3 + $0x30] sm:$0xff]  ;;  %s3978_s25 = scalar_lea.vmem %s3097_s1, 128  ;;  %p3983_p3 = scmp.lt.s32.totalorder %s3097_s1, %s3097_s1 }
  0x4d   :  { %3338 = vmatpush3.msra.mxu0 %v123_v3  ;;  %3339 = vmatprep.mubr.msk.f32.mxu0 %vm125_vm1, %v115_v5  ;;  %v4149_v30 = vld [vmem:[#allocation9 + $0x18] sm:$0xff]  ;;  %v4153_v31 = vld [vmem:[#allocation11 + $0x10] sm:$0xff]  ;;  %v4161_v35 = vld [vmem:[#allocation9 + $0x8] sm:$0xff]  ;;  %p3979_p2 = scmp.ne.s32.totalorder %s3097_s1, %s3978_s25  ;;  %p3984_p4 = scmp.lt.s32.totalorder %s3978_s25, %s3978_s25 }
  0x4e   :  { %3355 = vmatprep.subr.mxu1 %v4016_v0  ;;  %3340 = vmatmul.mubr.msk.f32.vlgmr.msra.gmra.mxu0 %vm125_vm1, %v116_v6  ;;  %v4155_v32 = vld [vmem:[#allocation9 + $0x10] sm:$0xff]  ;;  %v120_v33 = vld [vmem:[#allocation3 + $0x28] sm:$0xff]  ;;  %v4165_v36 = vld [vmem:[#allocation11 + $0x8] sm:$0xff] }
  0x4f   :  { %3356 = vmatpush3.msra.mxu1 %v4117_v7  ;;  %3373 = vmatprep.subr.mxu0 %v4016_v0  ;;  %v4169_v37 = vld [vmem:[#allocation9] sm:$0xff]  ;;  %v122_v38 = vld [vmem:[#allocation3 + $0x38] sm:$0xff]  ;;  %v4235_v53 = vld [vmem:[%s4686_s6] ss:$0 sm:$0xff]  ;;  %p3985_p5 = por %p3984_p4, %p3983_p3 }
  0x50   :  { %3357 = vmatprep.subr.mxu1 %v4016_v0  ;;  %3342 = vmatprep.mubr.msk.f32.mxu0 %vm125_vm1, %v117_v26  ;;  %v4175_v39 = vld [vmem:[#allocation11] sm:$0xff] }
  0x51   :  { %3358 = vmatpush3.msra.mxu1 %v4122_v8  ;;  %3374 = vmatpush3.msra.mxu0 %v4145_v28  ;;  %p3986_p6 = pnand %p3985_p5, %p3979_p2 }
  0x52   :  { %3360 = vmatmul.mubr.f32.vlgmr.msra.gmra.mxu1 %v4016_v0  ;;  %3362 = vmatprep.subr.mxu1 %v4016_v0 }
  0x53   :  { %3370 = vmatprep.mubr.msk.f32.mxu1 %vm4017_vm0, %v4016_v0  ;;  %3343 = vmatmul.mubr.msk.f32.gmra.mxu0 %vm125_vm1, %v118_v27 }
  0x54   :  { %3363 = vmatpush3.msra.mxu1 %v4149_v30  ;;  %3345 = vmatprep.mubr.msk.f32.mxu0 %vm125_vm1, %v119_v29 }
  0x55   :  { %3375 = vmatprep.subr.mxu0 %v4016_v0  ;;  %3364 = vmatprep.subr.mxu1 %v4016_v0 }
  0x56   :  { %3376 = vmatpush3.msra.mxu0 %v4153_v31  ;;  %3365 = vmatpush3.msra.mxu1 %v4155_v32 }
  0x57   :  { %3377 = vmatprep.subr.mxu0 %v4016_v0  ;;  %3346 = vmatmul.mubr.msk.f32.gmra.mxu0 %vm125_vm1, %v120_v33 }
  0x58   :  { %3366 = vmatprep.subr.mxu1 %v4016_v0  ;;  %3348 = vmatprep.mubr.msk.f32.mxu0 %vm125_vm1, %v121_v34 }
  0x59   :  { %3367 = vmatpush3.msra.mxu1 %v4161_v35  ;;  %3378 = vmatpush3.msra.mxu0 %v4165_v36 }
  0x5a   :  { %3368 = vmatprep.subr.mxu1 %v4016_v0  ;;  %3379 = vmatprep.subr.mxu0 %v4016_v0 }
  0x5b   :  { %3369 = vmatpush3.msra.mxu1 %v4169_v37  ;;  %3349 = vmatmul.mubr.msk.f32.gmra.mxu0 %vm125_vm1, %v122_v38  ;;  %v569_v38 = vld [vmem:[#allocation12 + $0x10] sm:$0xff] }
  0x5c   :  { %3384 = vmatprep.subr.mxu1 %v4016_v0  ;;  %3380 = vmatpush3.msra.mxu0 %v4175_v39 }
  0x5d   :  { %3381 = vmatprep.mubr.msk.f32.mxu0 %vm4017_vm0, %v4016_v0  ;;  %3395 = vmatprep.subr.mxu0 %v4016_v0 }
  0x5f   :  { %3382 = vmatmul.mubr.f32.vlgmr.msra.gmra.mxu0 %v4016_v0 }
  0x60   :  { %3396 = vmatpush3.msra.mxu0 %v4149_v30  ;;  %3403 = vmatprep.mubr.msk.f32.mxu0 %vm4017_vm0, %v4016_v0 }
  0x61   :  { %3397 = vmatprep.subr.mxu0 %v4016_v0 }
  0x62   :  { %3398 = vmatpush3.msra.mxu0 %v4155_v32 }
  0x63   :  { %3399 = vmatprep.subr.mxu0 %v4016_v0 }
  0x64   :  { %3400 = vmatpush3.msra.mxu0 %v4161_v35 }
  0x65   :  { %3401 = vmatprep.subr.mxu0 %v4016_v0 }
  0x66   :  { %3402 = vmatpush3.msra.mxu0 %v4169_v37 }
  0x67   :  { %3417 = vmatprep.subr.mxu0 %v4016_v0 }
 0x10e   :  { %v4132_v9 = vpop.f32.mrf.mxu0 }
 0x10f   :  { %v263_v57 = vadd.f32 %v4132_v9, %v4137_v10 }
 0x110   :  { %v216_v11 = vpop.f32.mrf.mxu0 }
 0x111   :  { %v262_v12 = vadd.f32 %v4137_v10, %v216_v11 }
 0x112   :  { %v364_v13 = vpop.f32.mrf.mxu1 }
 0x113   :  { %v368_v14 = vadd.f32 %v364_v13, %v262_v12  ;;  %v4220_v44 = vpop.f32.mrf.mxu0 }
 0x114   :  { %v3361_v15 = vpop.f32.mrf.mxu1 }
 0x115   :  { %3716 = vtanh.f32 %v368_v14  ;;  %v3118_v17 = vmul.f32 -1.442695, %v368_v14  ;;  %v4222_v45 = vpop.f32.mrf.mxu0 }
 0x117   :  { %3718 = vpow2.f32 %v3118_v17  ;;  %v4224_v46 = vpop.f32.mrf.mxu0 }
 0x119   :  { %v4226_v47 = vpop.f32.mrf.mxu0 }
 0x11b   :  { %v4228_v48 = vpop.f32.mrf.mxu0 }
 0x11d   :  { %v4230_v49 = vpop.f32.mrf.mxu0 }
 0x11f   :  { %v538_v50 = vpop.f32.mrf.mxu0 }
 0x121   :  { %v3383_v51 = vpop.f32.mrf.mxu0 }
 0x122   :  { %v3717_v16 = vpop.eup %3716 }
 0x123   :  { %378 = vrot.lane.b32.xlu0 %v3717_v16, %s4018_s14 }
 0x124   :  { %v3719_v18 = vpop.eup %3718 }
 0x125   :  { %v372_v19 = vadd.f32 1.0, %v3719_v18 }
 0x127   :  { %3720 = vrcp.f32 %v372_v19 }
 0x134   :  { %v3721_v20 = vpop.eup %3720 }
 0x135   :  { %v376_v23 = vmul.f32 0.0, %v3721_v20 }
 0x195   :  { %v379_v21 = vpop.permute.xlu0 %378 }
 0x196   :  { %v381_v22 = vmul.f32 %v3721_v20, %v379_v21 }
 0x198   :  { %383 = vrot.lane.b32.xlu0 %v381_v22, %s4019_s15 }
 0x20a   :  { %v384_v24 = vpop.permute.xlu0 %383 }
 0x20b   :  { %v4142_v25 = vadd.f32 %v384_v24, %v376_v23 }
 0x20d   :  { %3722 = vtanh.f32 %v4142_v25 }
 0x21a   :  { %v3723_v40 = vpop.eup %3722 }
 0x21b   :  { %389 = vrot.lane.b32.xlu1 %v3723_v40, %s4018_s14  ;;  %v568_v40 = vld [vmem:[#allocation12 + $0x8] sm:$0xff] }
 0x28d   :  { %v390_v41 = vpop.permute.xlu1 %389 }
 0x28e   :  { %v392_v42 = vmul.f32 %v3721_v20, %v390_v41  ;;  %v567_v41 = vld [vmem:[#allocation12] sm:$0xff] }
 0x290   :  { %398 = vrot.lane.b32.xlu1 %v392_v42, %s4019_s15 }
 0x302   :  { %v399_v43 = vpop.permute.xlu1 %398 }
 0x303   :  { %3371 = vmatmul.mubr.msk.f32.vlgmr.msra.gmra.mxu1 %vm294_vm2, %v399_v43 }
 0x304   :  { %3385 = vmatpush3.msra.mxu1 %v4110_v2  ;;  %3392 = vmatprep.mubr.msk.f32.mxu1 %vm4017_vm0, %v4016_v0 }
 0x305   :  { %3386 = vmatprep.subr.mxu1 %v4016_v0 }
 0x306   :  { %3387 = vmatpush3.msra.mxu1 %v4113_v4 }
 0x307   :  { %3388 = vmatprep.subr.mxu1 %v4016_v0 }
 0x308   :  { %3389 = vmatpush3.msra.mxu1 %v4117_v7 }
 0x309   :  { %3390 = vmatprep.subr.mxu1 %v4016_v0 }
 0x30a   :  { %3391 = vmatpush3.msra.mxu1 %v4122_v8 }
 0x30b   :  { %3393 = vmatmul.mubr.msk.f32.vlgmr.msra.gmra.mxu1 %vm294_vm2, %v399_v43  ;;  %3406 = vmatprep.subr.mxu1 %v4016_v0 }
 0x30c   :  { %3407 = vmatpush3.msra.mxu1 %v4145_v28  ;;  %3414 = vmatprep.mubr.msk.f32.mxu1 %vm4017_vm0, %v4016_v0 }
 0x30d   :  { %3408 = vmatprep.subr.mxu1 %v4016_v0 }
 0x30e   :  { %3409 = vmatpush3.msra.mxu1 %v4153_v31 }
 0x30f   :  { %3410 = vmatprep.subr.mxu1 %v4016_v0 }
 0x310   :  { %3411 = vmatpush3.msra.mxu1 %v4165_v36 }
 0x311   :  { %3412 = vmatprep.subr.mxu1 %v4016_v0 }
 0x312   :  { %3413 = vmatpush3.msra.mxu1 %v4175_v39 }
 0x313   :  { %3428 = vmatprep.subr.mxu1 %v4016_v0 }
 0x3c3   :  { %v468_v52 = vpop.f32.mrf.mxu1 }
 0x3c4   :  { %v539_v54 = vadd.f32 %v538_v50, %v468_v52 }
 0x3c5   :  { %v3372_v55 = vpop.f32.mrf.mxu1 }
 0x3c6   :  { %v542_v56 = vadd.f32 %v4235_v53, %v539_v54 }
 0x3c8   :  { %3724 = vtanh.f32 %v542_v56  ;;  %v3120_v63 = vmul.f32 -1.442695, %v542_v56 }
 0x3cb   :  { %v639_v58 = vpop.f32.mrf.mxu1 }
 0x3cc   :  { %v643_v59 = vadd.f32 %v639_v58, %v263_v57 }
 0x3cd   :  { %v3394_v60 = vpop.f32.mrf.mxu1 }
 0x3ce   :  { %3726 = vtanh.f32 %v643_v59  ;;  %v3122_v1 = vmul.f32 -1.442695, %v643_v59 }
 0x3cf   :  { %3728 = vpow2.f32 %v3120_v63 }
 0x3d0   :  { %3730 = vpow2.f32 %v3122_v1 }
 0x3d5   :  { %v3725_v61 = vpop.eup %3724 }
 0x3d6   :  { %552 = vrot.lane.b32.xlu0 %v3725_v61, %s4018_s14 }
 0x3db   :  { %v3727_v62 = vpop.eup %3726 }
 0x3dc   :  { %653 = vrot.lane.b32.xlu1 %v3727_v62, %s4018_s14  ;;  %v3729_v3 = vpop.eup %3728 }
 0x3dd   :  { %v546_v5 = vadd.f32 1.0, %v3729_v3  ;;  %v3731_v6 = vpop.eup %3730 }
 0x3de   :  { %v647_v11 = vadd.f32 1.0, %v3731_v6 }
 0x3df   :  { %3732 = vrcp.f32 %v546_v5 }
 0x3e0   :  { %3734 = vrcp.f32 %v647_v11  ;;  %v847_v11 = vld [vmem:[#allocation12 + $0x38] sm:$0xff] }
 0x3ec   :  { %v3733_v9 = vpop.eup %3732 }
 0x3ed   :  { %v3735_v14 = vpop.eup %3734  ;;  %v550_v17 = vmul.f32 0.0, %v3733_v9 }
 0x3ee   :  { %v651_v20 = vmul.f32 %v3735_v14, %v4142_v25  ;;  %v570_v25 = vld [vmem:[#allocation12 + $0x18] sm:$0xff] }
 0x448   :  { %v553_v12 = vpop.permute.xlu0 %552 }
 0x449   :  { %v555_v13 = vmul.f32 %v3733_v9, %v553_v12  ;;  %v845_v12 = vld [vmem:[#allocation12 + $0x28] sm:$0xff] }
 0x44b   :  { %557 = vrot.lane.b32.xlu0 %v555_v13, %s4019_s15  ;;  %v844_v13 = vld [vmem:[#allocation12 + $0x20] sm:$0xff] }
 0x44e   :  { %v654_v15 = vpop.permute.xlu1 %653 }
 0x44f   :  { %v656_v16 = vmul.f32 %v3735_v14, %v654_v15 }
 0x451   :  { %658 = vrot.lane.b32.xlu1 %v656_v16, %s4019_s15 }
 0x4bd   :  { %v558_v18 = vpop.permute.xlu0 %557 }
 0x4be   :  { %v4244_v19 = vadd.f32 %v558_v18, %v550_v17 }
 0x4c0   :  { %3736 = vtanh.f32 %v4244_v19 }
 0x4c3   :  { %v659_v21 = vpop.permute.xlu1 %658 }
 0x4c4   :  { %v4248_v22 = vadd.f32 %v659_v21, %v651_v20  ;;  %v264_v20 = vadd.f32 %v4137_v10, %v4222_v45 }
 0x4c6   :  { %3738 = vtanh.f32 %v4248_v22 }
 0x4cd   :  { %v3737_v23 = vpop.eup %3736 }
 0x4ce   :  { %563 = vrot.lane.b32.xlu0 %v3737_v23, %s4018_s14 }
 0x4d3   :  { %v3739_v24 = vpop.eup %3738 }
 0x4d4   :  { %664 = vrot.lane.b32.xlu1 %v3739_v24, %s4018_s14 }
 0x540   :  { %v564_v26 = vpop.permute.xlu0 %563 }
 0x541   :  { %v566_v27 = vmul.f32 %v3733_v9, %v564_v26  ;;  %v846_v9 = vld [vmem:[#allocation12 + $0x30] sm:$0xff] }
 0x543   :  { %744 = vrot.lane.b32.xlu1 %v566_v27, %s4019_s15 }
 0x546   :  { %v665_v29 = vpop.permute.xlu1 %664 }
 0x547   :  { %v667_v33 = vmul.f32 %v3735_v14, %v665_v29 }
 0x549   :  { %669 = vrot.lane.b32.xlu0 %v667_v33, %s4019_s15 }
 0x5b5   :  { %v745_v34 = vpop.permute.xlu1 %744 }
 0x5b6   :  { %3415 = vmatmul.mubr.msk.f32.vlgmr.msra.gmra.mxu1 %vm294_vm2, %v745_v34 }
 0x5b7   :  { %3429 = vmatpush3.msra.mxu1 %v570_v25  ;;  %3436 = vmatprep.mubr.msk.f32.mxu1 %vm4017_vm0, %v4016_v0 }
 0x5b8   :  { %3430 = vmatprep.subr.mxu1 %v4016_v0 }
 0x5b9   :  { %3431 = vmatpush3.msra.mxu1 %v569_v38 }
 0x5ba   :  { %3432 = vmatprep.subr.mxu1 %v4016_v0 }
 0x5bb   :  { %3433 = vmatpush3.msra.mxu1 %v568_v40  ;;  %v4260_v42 = vpop.permute.xlu0 %669 }
 0x5bc   :  { %3404 = vmatmul.mubr.msk.f32.vlgmr.msra.gmra.mxu0 %vm294_vm2, %v4260_v42  ;;  %3434 = vmatprep.subr.mxu1 %v4016_v0 }
 0x5bd   :  { %3435 = vmatpush3.msra.mxu1 %v567_v41  ;;  %3425 = vmatprep.mubr.msk.f32.mxu0 %vm4017_vm0, %v4016_v0 }
 0x5be   :  { %3437 = vmatmul.mubr.msk.f32.vlgmr.msra.gmra.mxu1 %vm294_vm2, %v745_v34  ;;  %3450 = vmatprep.subr.mxu1 %v4016_v0 }
 0x5bf   :  { %3451 = vmatpush3.msra.mxu1 %v4149_v30  ;;  %3458 = vmatprep.mubr.msk.f32.mxu1 %vm4017_vm0, %v4016_v0 }
 0x5c0   :  { %3452 = vmatprep.subr.mxu1 %v4016_v0  ;;  %3418 = vmatpush3.msra.mxu0 %v847_v11 }
 0x5c1   :  { %3453 = vmatpush3.msra.mxu1 %v4155_v32  ;;  %3419 = vmatprep.subr.mxu0 %v4016_v0 }
 0x5c2   :  { %3454 = vmatprep.subr.mxu1 %v4016_v0  ;;  %3420 = vmatpush3.msra.mxu0 %v846_v9 }
 0x5c3   :  { %3455 = vmatpush3.msra.mxu1 %v4161_v35  ;;  %3421 = vmatprep.subr.mxu0 %v4016_v0 }
 0x5c4   :  { %3456 = vmatprep.subr.mxu1 %v4016_v0  ;;  %3422 = vmatpush3.msra.mxu0 %v845_v12 }
 0x5c5   :  { %3457 = vmatpush3.msra.mxu1 %v4169_v37  ;;  %3423 = vmatprep.subr.mxu0 %v4016_v0 }
 0x5c6   :  { %3472 = vmatprep.subr.mxu1 %v4016_v0  ;;  %3424 = vmatpush3.msra.mxu0 %v844_v13 }
 0x5c7   :  { %3439 = vmatprep.subr.mxu0 %v4016_v0 }
 0x676   :  { %v814_v43 = vpop.f32.mrf.mxu1 }
 0x678   :  { %v3416_v50 = vpop.f32.mrf.mxu1 }
 0x67c   :  { %v739_v51 = vpop.f32.mrf.mxu0 }
 0x67d   :  { %v815_v52 = vadd.f32 %v814_v43, %v739_v51 }
 0x67e   :  { %v3405_v54 = vpop.f32.mrf.mxu0  ;;  %v4279_v55 = vpop.f32.mrf.mxu1 }
 0x67f   :  { %v818_v56 = vadd.f32 %v4235_v53, %v815_v52 }
 0x680   :  { %v3438_v57 = vpop.f32.mrf.mxu1 }
 0x681   :  { %3740 = vtanh.f32 %v818_v56  ;;  %v3125_v59 = vmul.f32 -1.442695, %v818_v56 }
 0x683   :  { %3742 = vpow2.f32 %v3125_v59 }
 0x68e   :  { %v3741_v58 = vpop.eup %3740 }
 0x68f   :  { %828 = vrot.lane.b32.xlu0 %v3741_v58, %s4018_s14 }
 0x690   :  { %v3743_v60 = vpop.eup %3742 }
 0x691   :  { %v822_v61 = vadd.f32 1.0, %v3743_v60 }
 0x693   :  { %3744 = vrcp.f32 %v822_v61 }
 0x6a0   :  { %v3745_v62 = vpop.eup %3744 }
 0x6a1   :  { %v826_v3 = vmul.f32 %v3745_v62, %v4244_v19 }
 0x701   :  { %v829_v63 = vpop.permute.xlu0 %828 }
 0x702   :  { %v831_v1 = vmul.f32 %v3745_v62, %v829_v63 }
 0x704   :  { %833 = vrot.lane.b32.xlu1 %v831_v1, %s4019_s15 }
 0x776   :  { %v834_v5 = vpop.permute.xlu1 %833 }
 0x777   :  { %v4285_v6 = vadd.f32 %v834_v5, %v826_v3 }
 0x779   :  { %3746 = vtanh.f32 %v4285_v6 }
 0x786   :  { %v3747_v14 = vpop.eup %3746 }
 0x787   :  { %839 = vrot.lane.b32.xlu0 %v3747_v14, %s4018_s14 }
 0x7f9   :  { %v840_v15 = vpop.permute.xlu0 %839 }
 0x7fa   :  { %v842_v16 = vmul.f32 %v3745_v62, %v840_v15 }
 0x7fc   :  { %849 = vrot.lane.b32.xlu1 %v842_v16, %s4019_s15 }
 0x86e   :  { %v850_v17 = vpop.permute.xlu1 %849 }
 0x86f   :  { %3426 = vmatmul.mubr.msk.f32.vlgmr.msra.gmra.mxu0 %vm294_vm2, %v850_v17 }
 0x870   :  { %3440 = vmatpush3.msra.mxu0 %v4110_v2  ;;  %3447 = vmatprep.mubr.msk.f32.mxu0 %vm4017_vm0, %v4016_v0 }
 0x871   :  { %3441 = vmatprep.subr.mxu0 %v4016_v0 }
 0x872   :  { %3442 = vmatpush3.msra.mxu0 %v4113_v4 }
 0x873   :  { %3443 = vmatprep.subr.mxu0 %v4016_v0 }
 0x874   :  { %3444 = vmatpush3.msra.mxu0 %v4117_v7 }
 0x875   :  { %3445 = vmatprep.subr.mxu0 %v4016_v0 }
 0x876   :  { %3446 = vmatpush3.msra.mxu0 %v4122_v8 }
 0x877   :  { %3448 = vmatmul.mubr.msk.f32.vlgmr.msra.gmra.mxu0 %vm294_vm2, %v4260_v42  ;;  %3461 = vmatprep.subr.mxu0 %v4016_v0 }
 0x878   :  { %3462 = vmatpush3.msra.mxu0 %v4145_v28  ;;  %3469 = vmatprep.mubr.msk.f32.mxu0 %vm4017_vm0, %v4016_v0 }
 0x879   :  { %3463 = vmatprep.subr.mxu0 %v4016_v0 }
 0x87a   :  { %3464 = vmatpush3.msra.mxu0 %v4153_v31 }
 0x87b   :  { %3465 = vmatprep.subr.mxu0 %v4016_v0 }
 0x87c   :  { %3466 = vmatpush3.msra.mxu0 %v4165_v36 }
 0x87d   :  { %3467 = vmatprep.subr.mxu0 %v4016_v0 }
 0x87e   :  { %3468 = vmatpush3.msra.mxu0 %v4175_v39 }
 0x87f   :  { %3470 = vmatmul.mubr.msk.f32.vlgmr.msra.gmra.mxu0 %vm294_vm2, %v850_v17  ;;  %3483 = vmatprep.subr.mxu0 %v4016_v0 }
 0x880   :  { %3484 = vmatpush3.msra.mxu0 %v4110_v2  ;;  %3491 = vmatprep.mubr.msk.f32.mxu0 %vm4017_vm0, %v4016_v0 }
 0x881   :  { %3485 = vmatprep.subr.mxu0 %v4016_v0 }
 0x882   :  { %3486 = vmatpush3.msra.mxu0 %v4113_v4 }
 0x883   :  { %3487 = vmatprep.subr.mxu0 %v4016_v0 }
 0x884   :  { %3488 = vmatpush3.msra.mxu0 %v4117_v7 }
 0x885   :  { %3489 = vmatprep.subr.mxu0 %v4016_v0 }
 0x886   :  { %3490 = vmatpush3.msra.mxu0 %v4122_v8 }
 0x887   :  { %3505 = vmatprep.subr.mxu0 %v4016_v0 }
 0x92f   :  { %v4328_v18 = vpop.f32.mrf.mxu0 }
 0x931   :  { %v3427_v19 = vpop.f32.mrf.mxu0 }
 0x937   :  { %v1061_v21 = vpop.f32.mrf.mxu0 }
 0x938   :  { %v1065_v23 = vadd.f32 %v1061_v21, %v264_v20 }
 0x939   :  { %v3449_v24 = vpop.f32.mrf.mxu0 }
 0x93a   :  { %3748 = vtanh.f32 %v1065_v23  ;;  %v3129_v33 = vmul.f32 -1.442695, %v1065_v23 }
 0x93c   :  { %3750 = vpow2.f32 %v3129_v33  ;;  %v1263_v33 = vld [vmem:[#allocation12 + $0x50] sm:$0xff] }
 0x93f   :  { %v1231_v26 = vpop.f32.mrf.mxu0 }
 0x941   :  { %v3471_v27 = vpop.f32.mrf.mxu0 }
 0x947   :  { %v3749_v29 = vpop.eup %3748 }
 0x948   :  { %1075 = vrot.lane.b32.xlu0 %v3749_v29, %s4018_s14  ;;  %v1264_v29 = vld [vmem:[#allocation12 + $0x58] sm:$0xff] }
 0x949   :  { %v3751_v25 = vpop.eup %3750 }
 0x94a   :  { %v1069_v34 = vadd.f32 1.0, %v3751_v25  ;;  %v1262_v25 = vld [vmem:[#allocation12 + $0x48] sm:$0xff] }
 0x94c   :  { %3752 = vrcp.f32 %v1069_v34 }
 0x959   :  { %v3753_v38 = vpop.eup %3752 }
 0x95a   :  { %v1073_v45 = vmul.f32 %v3753_v38, %v4248_v22  ;;  %v265_v22 = vadd.f32 %v4220_v44, %v4137_v10 }
 0x9ba   :  { %v1076_v40 = vpop.permute.xlu0 %1075 }
 0x9bb   :  { %v1078_v41 = vmul.f32 %v3753_v38, %v1076_v40 }
 0x9bd   :  { %1080 = vrot.lane.b32.xlu1 %v1078_v41, %s4019_s15 }
 0xa2f   :  { %v1081_v42 = vpop.permute.xlu1 %1080 }
 0xa30   :  { %v1083_v43 = vadd.f32 %v1081_v42, %v1073_v45 }
 0xa32   :  { %3754 = vtanh.f32 %v1083_v43 }
 0xa3f   :  { %v3755_v50 = vpop.eup %3754 }
 0xa40   :  { %1086 = vrot.lane.b32.xlu0 %v3755_v50, %s4018_s14 }
 0xab2   :  { %v1087_v51 = vpop.permute.xlu0 %1086 }
 0xab3   :  { %v1089_v52 = vmul.f32 %v3753_v38, %v1087_v51  ;;  %v1261_v38 = vld [vmem:[#allocation12 + $0x40] sm:$0xff]  ;;  %v990_v51 = vadd.f32 %v4279_v55, %v4328_v18 }
 0xab5   :  { %1091 = vrot.lane.b32.xlu1 %v1089_v52, %s4019_s15 }
 0xb27   :  { %v1092_v54 = vpop.permute.xlu1 %1091 }
 0xb28   :  { %3459 = vmatmul.mubr.msk.f32.vlgmr.msra.gmra.mxu1 %vm294_vm2, %v1092_v54  ;;  %3492 = vmatmul.mubr.msk.f32.vlgmr.msra.gmra.mxu0 %vm294_vm2, %v1092_v54 }
 0xb29   :  { %3506 = vmatpush3.msra.mxu0 %v4145_v28  ;;  %3480 = vmatprep.mubr.msk.f32.mxu1 %vm4017_vm0, %v4016_v0 }
 0xb2a   :  { %3507 = vmatprep.subr.mxu0 %v4016_v0  ;;  %3513 = vmatprep.mubr.msk.f32.mxu0 %vm4017_vm0, %v4016_v0 }
 0xb2b   :  { %3508 = vmatpush3.msra.mxu0 %v4153_v31  ;;  %3473 = vmatpush3.msra.mxu1 %v1264_v29 }
 0xb2c   :  { %3509 = vmatprep.subr.mxu0 %v4016_v0  ;;  %3474 = vmatprep.subr.mxu1 %v4016_v0 }
 0xb2d   :  { %3510 = vmatpush3.msra.mxu0 %v4165_v36  ;;  %3475 = vmatpush3.msra.mxu1 %v1263_v33 }
 0xb2e   :  { %3511 = vmatprep.subr.mxu0 %v4016_v0  ;;  %3476 = vmatprep.subr.mxu1 %v4016_v0 }
 0xb2f   :  { %3512 = vmatpush3.msra.mxu0 %v4175_v39  ;;  %3477 = vmatpush3.msra.mxu1 %v1262_v25  ;;  %v1612_v25 = vld [vmem:[#allocation12 + $0x78] sm:$0xff] }
 0xb30   :  { %3527 = vmatprep.subr.mxu0 %v4016_v0  ;;  %3478 = vmatprep.subr.mxu1 %v4016_v0 }
 0xb31   :  { %3479 = vmatpush3.msra.mxu1 %v1261_v38  ;;  %v1609_v38 = vld [vmem:[#allocation12 + $0x60] sm:$0xff] }
 0xb32   :  { %3494 = vmatprep.subr.mxu1 %v4016_v0 }
 0xbe8   :  { %v1161_v56 = vpop.f32.mrf.mxu1  ;;  %v1409_v57 = vpop.f32.mrf.mxu0 }
 0xbe9   :  { %v1232_v58 = vadd.f32 %v1231_v26, %v1161_v56  ;;  %v1413_v59 = vadd.f32 %v1409_v57, %v265_v22 }
 0xbea   :  { %v3460_v60 = vpop.f32.mrf.mxu1  ;;  %v3493_v61 = vpop.f32.mrf.mxu0 }
 0xbeb   :  { %v1235_v62 = vadd.f32 %v4235_v53, %v1232_v58  ;;  %3756 = vtanh.f32 %v1413_v59  ;;  %v3135_v3 = vmul.f32 -1.442695, %v1413_v59  ;;  %v266_v58 = vadd.f32 %v4137_v10, %v4226_v47 }
 0xbed   :  { %3758 = vtanh.f32 %v1235_v62  ;;  %v3132_v5 = vmul.f32 -1.442695, %v1235_v62 }
 0xbee   :  { %3760 = vpow2.f32 %v3135_v3 }
 0xbef   :  { %3762 = vpow2.f32 %v3132_v5 }
 0xbf8   :  { %v3757_v63 = vpop.eup %3756 }
 0xbf9   :  { %1423 = vrot.lane.b32.xlu1 %v3757_v63, %s4018_s14 }
 0xbfa   :  { %v3759_v1 = vpop.eup %3758 }
 0xbfb   :  { %1245 = vrot.lane.b32.xlu0 %v3759_v1, %s4018_s14  ;;  %v3761_v44 = vpop.eup %3760 }
 0xbfc   :  { %v3763_v11 = vpop.eup %3762  ;;  %v1417_v9 = vadd.f32 1.0, %v3761_v44 }
 0xbfd   :  { %v1239_v12 = vadd.f32 1.0, %v3763_v11 }
 0xbfe   :  { %3764 = vrcp.f32 %v1417_v9 }
 0xbff   :  { %3766 = vrcp.f32 %v1239_v12 }
 0xc0b   :  { %v3765_v13 = vpop.eup %3764 }
 0xc0c   :  { %v3767_v16 = vpop.eup %3766  ;;  %v1421_v20 = vmul.f32 %v3765_v13, %v1083_v43 }
 0xc0d   :  { %v1243_v24 = vmul.f32 %v3767_v16, %v4285_v6 }
 0xc6b   :  { %v1424_v14 = vpop.permute.xlu1 %1423 }
 0xc6c   :  { %v1426_v15 = vmul.f32 %v3765_v13, %v1424_v14 }
 0xc6d   :  { %v1246_v17 = vpop.permute.xlu0 %1245 }
 0xc6e   :  { %v1248_v19 = vmul.f32 %v3767_v16, %v1246_v17  ;;  %1428 = vrot.lane.b32.xlu1 %v1426_v15, %s4019_s15 }
 0xc70   :  { %1250 = vrot.lane.b32.xlu0 %v1248_v19, %s4019_s15 }
 0xce0   :  { %v1429_v21 = vpop.permute.xlu1 %1428 }
 0xce1   :  { %v4358_v23 = vadd.f32 %v1429_v21, %v1421_v20 }
 0xce2   :  { %v1251_v26 = vpop.permute.xlu0 %1250 }
 0xce3   :  { %3768 = vtanh.f32 %v4358_v23  ;;  %v4362_v27 = vadd.f32 %v1251_v26, %v1243_v24 }
 0xce5   :  { %3770 = vtanh.f32 %v4362_v27 }
 0xcf0   :  { %v3769_v6 = vpop.eup %3768 }
 0xcf1   :  { %1434 = vrot.lane.b32.xlu1 %v3769_v6, %s4018_s14  ;;  %v1611_v6 = vld [vmem:[#allocation12 + $0x70] sm:$0xff] }
 0xcf2   :  { %v3771_v34 = vpop.eup %3770 }
 0xcf3   :  { %1256 = vrot.lane.b32.xlu0 %v3771_v34, %s4018_s14  ;;  %v1610_v34 = vld [vmem:[#allocation12 + $0x68] sm:$0xff] }
 0xd63   :  { %v1435_v40 = vpop.permute.xlu1 %1434 }
 0xd64   :  { %v1437_v41 = vmul.f32 %v3765_v13, %v1435_v40 }
 0xd65   :  { %v1257_v45 = vpop.permute.xlu0 %1256 }
 0xd66   :  { %v1259_v42 = vmul.f32 %v3767_v16, %v1257_v45  ;;  %1439 = vrot.lane.b32.xlu1 %v1437_v41, %s4019_s15 }
 0xd68   :  { %1266 = vrot.lane.b32.xlu0 %v1259_v42, %s4019_s15 }
 0xdd8   :  { %v1440_v50 = vpop.permute.xlu1 %1439 }
 0xdda   :  { %v1267_v43 = vpop.permute.xlu0 %1266 }
 0xddb   :  { %3481 = vmatmul.mubr.msk.f32.vlgmr.msra.gmra.mxu1 %vm294_vm2, %v1267_v43  ;;  %3514 = vmatmul.mubr.msk.f32.vlgmr.msra.gmra.mxu0 %vm294_vm2, %v1267_v43 }
 0xddc   :  { %3495 = vmatpush3.msra.mxu1 %v4149_v30  ;;  %3528 = vmatpush3.msra.mxu0 %v4110_v2 }
 0xddd   :  { %3496 = vmatprep.subr.mxu1 %v4016_v0  ;;  %3529 = vmatprep.subr.mxu0 %v4016_v0 }
 0xdde   :  { %3497 = vmatpush3.msra.mxu1 %v4155_v32  ;;  %3530 = vmatpush3.msra.mxu0 %v4113_v4 }
 0xddf   :  { %3498 = vmatprep.subr.mxu1 %v4016_v0  ;;  %3531 = vmatprep.subr.mxu0 %v4016_v0 }
 0xde0   :  { %3499 = vmatpush3.msra.mxu1 %v4161_v35  ;;  %3532 = vmatpush3.msra.mxu0 %v4117_v7 }
 0xde1   :  { %3500 = vmatprep.subr.mxu1 %v4016_v0  ;;  %3533 = vmatprep.subr.mxu0 %v4016_v0 }
 0xde2   :  { %3501 = vmatpush3.msra.mxu1 %v4169_v37  ;;  %3502 = vmatprep.mubr.msk.f32.mxu1 %vm4017_vm0, %v4016_v0 }
 0xde3   :  { %3534 = vmatpush3.msra.mxu0 %v4122_v8  ;;  %3535 = vmatprep.mubr.msk.f32.mxu0 %vm4017_vm0, %v4016_v0 }
 0xde4   :  { %3503 = vmatmul.mubr.msk.f32.vlgmr.msra.gmra.mxu1 %vm294_vm2, %v1440_v50  ;;  %3536 = vmatmul.mubr.msk.f32.vlgmr.msra.gmra.mxu0 %vm294_vm2, %v1440_v50 }
 0xde5   :  { %3516 = vmatprep.subr.mxu1 %v4016_v0  ;;  %3549 = vmatprep.subr.mxu0 %v4016_v0 }
 0xde6   :  { %3550 = vmatpush3.msra.mxu0 %v4145_v28  ;;  %3524 = vmatprep.mubr.msk.f32.mxu1 %vm4017_vm0, %v4016_v0 }
 0xde7   :  { %3551 = vmatprep.subr.mxu0 %v4016_v0  ;;  %3557 = vmatprep.mubr.msk.f32.mxu0 %vm4017_vm0, %v4016_v0 }
 0xde8   :  { %3552 = vmatpush3.msra.mxu0 %v4153_v31  ;;  %3517 = vmatpush3.msra.mxu1 %v1612_v25  ;;  %v4516_v25 = vld [vmem:[#allocation9 + $0x8] sm:$0xff] }
 0xde9   :  { %3553 = vmatprep.subr.mxu0 %v4016_v0  ;;  %3518 = vmatprep.subr.mxu1 %v4016_v0 }
 0xdea   :  { %3554 = vmatpush3.msra.mxu0 %v4165_v36  ;;  %3519 = vmatpush3.msra.mxu1 %v1611_v6  ;;  %v4519_v6 = vld [vmem:[#allocation8 + $0x8] sm:$0xff] }
 0xdeb   :  { %3555 = vmatprep.subr.mxu0 %v4016_v0  ;;  %3520 = vmatprep.subr.mxu1 %v4016_v0 }
 0xdec   :  { %3556 = vmatpush3.msra.mxu0 %v4175_v39  ;;  %3521 = vmatpush3.msra.mxu1 %v1610_v34  ;;  %v4524_v34 = vld [vmem:[#allocation9] sm:$0xff] }
 0xded   :  { %3571 = vmatprep.subr.mxu0 %v4016_v0  ;;  %3522 = vmatprep.subr.mxu1 %v4016_v0 }
 0xdee   :  { %3523 = vmatpush3.msra.mxu1 %v1609_v38  ;;  %v4538_v38 = vld [vmem:[#allocation11 + $0x18] sm:$0xff] }
 0xdef   :  { %3538 = vmatprep.subr.mxu1 %v4016_v0 }
 0xe9b   :  { %v1336_v52 = vpop.f32.mrf.mxu1  ;;  %v1579_v54 = vpop.f32.mrf.mxu0 }
 0xe9c   :  { %v4411_v22 = vadd.f32 %v1336_v52, %v990_v51 }
 0xe9d   :  { %v3482_v56 = vpop.f32.mrf.mxu1  ;;  %v3515_v57 = vpop.f32.mrf.mxu0 }
 0xea4   :  { %v1509_v59 = vpop.f32.mrf.mxu1  ;;  %v1757_v60 = vpop.f32.mrf.mxu0 }
 0xea5   :  { %v1580_v61 = vadd.f32 %v1579_v54, %v1509_v59  ;;  %v1761_v62 = vadd.f32 %v1757_v60, %v266_v58 }
 0xea6   :  { %v3504_v63 = vpop.f32.mrf.mxu1  ;;  %v3537_v1 = vpop.f32.mrf.mxu0 }
 0xea7   :  { %v1583_v3 = vadd.f32 %v4235_v53, %v1580_v61  ;;  %3772 = vtanh.f32 %v1761_v62  ;;  %v3141_v5 = vmul.f32 -1.442695, %v1761_v62 }
 0xea9   :  { %3774 = vtanh.f32 %v1583_v3  ;;  %v3138_v44 = vmul.f32 -1.442695, %v1583_v3 }
 0xeaa   :  { %3776 = vpow2.f32 %v3141_v5 }
 0xeab   :  { %3778 = vpow2.f32 %v3138_v44 }
 0xeb4   :  { %v3773_v55 = vpop.eup %3772 }
 0xeb5   :  { %1771 = vrot.lane.b32.xlu1 %v3773_v55, %s4018_s14 }
 0xeb6   :  { %v3775_v18 = vpop.eup %3774 }
 0xeb7   :  { %1593 = vrot.lane.b32.xlu0 %v3775_v18, %s4018_s14  ;;  %v3777_v47 = vpop.eup %3776 }
 0xeb8   :  { %v3779_v11 = vpop.eup %3778  ;;  %v1765_v9 = vadd.f32 1.0, %v3777_v47 }
 0xeb9   :  { %v1587_v12 = vadd.f32 1.0, %v3779_v11  ;;  %v1960_v11 = vld [vmem:[#allocation12 + $0x98] sm:$0xff] }
 0xeba   :  { %3780 = vrcp.f32 %v1765_v9  ;;  %v1959_v9 = vld [vmem:[#allocation12 + $0x90] sm:$0xff] }
 0xebb   :  { %3782 = vrcp.f32 %v1587_v12  ;;  %v1958_v12 = vld [vmem:[#allocation12 + $0x88] sm:$0xff] }
 0xec7   :  { %v3781_v13 = vpop.eup %3780 }
 0xec8   :  { %v3783_v16 = vpop.eup %3782  ;;  %v1769_v20 = vmul.f32 %v3781_v13, %v4358_v23 }
 0xec9   :  { %v1591_v26 = vmul.f32 %v3783_v16, %v4362_v27 }
 0xf27   :  { %v1772_v14 = vpop.permute.xlu1 %1771 }
 0xf28   :  { %v1774_v15 = vmul.f32 %v3781_v13, %v1772_v14 }
 0xf29   :  { %v1594_v17 = vpop.permute.xlu0 %1593 }
 0xf2a   :  { %v1596_v19 = vmul.f32 %v3783_v16, %v1594_v17  ;;  %1776 = vrot.lane.b32.xlu1 %v1774_v15, %s4019_s15  ;;  %v1957_v15 = vld [vmem:[#allocation12 + $0x80] sm:$0xff] }
 0xf2c   :  { %1598 = vrot.lane.b32.xlu0 %v1596_v19, %s4019_s15 }
 0xf9c   :  { %v1777_v21 = vpop.permute.xlu1 %1776 }
 0xf9d   :  { %v4421_v24 = vadd.f32 %v1777_v21, %v1769_v20 }
 0xf9e   :  { %v1599_v29 = vpop.permute.xlu0 %1598 }
 0xf9f   :  { %3784 = vtanh.f32 %v4421_v24  ;;  %v4425_v33 = vadd.f32 %v1599_v29, %v1591_v26  ;;  %v4503_v26 = vld [vmem:[#allocation8 + $0x18] sm:$0xff]  ;;  %v4508_v29 = vld [vmem:[#allocation9 + $0x10] sm:$0xff] }
 0xfa1   :  { %3786 = vtanh.f32 %v4425_v33 }
 0xfac   :  { %v3785_v23 = vpop.eup %3784 }
 0xfad   :  { %1782 = vrot.lane.b32.xlu1 %v3785_v23, %s4018_s14 }
 0xfae   :  { %v3787_v27 = vpop.eup %3786 }
 0xfaf   :  { %1604 = vrot.lane.b32.xlu0 %v3787_v27, %s4018_s14  ;;  %v4529_v27 = vld [vmem:[#allocation8] sm:$0xff] }
0x101f   :  { %v1783_v40 = vpop.permute.xlu1 %1782 }
0x1020   :  { %v1785_v41 = vmul.f32 %v3781_v13, %v1783_v40  ;;  %v4546_v40 = vld [vmem:[#allocation11 + $0x10] sm:$0xff] }
0x1021   :  { %v1605_v45 = vpop.permute.xlu0 %1604 }
0x1022   :  { %v1607_v42 = vmul.f32 %v3783_v16, %v1605_v45  ;;  %1787 = vrot.lane.b32.xlu1 %v1785_v41, %s4019_s15  ;;  %v4550_v41 = vld [vmem:[#allocation11 + $0x8] sm:$0xff]  ;;  %v4554_v45 = vld [vmem:[#allocation11] sm:$0xff] }
0x1024   :  { %1614 = vrot.lane.b32.xlu0 %v1607_v42, %s4019_s15 }
0x1096   :  { %v1615_v43 = vpop.permute.xlu0 %1614 }
0x1097   :  { %3525 = vmatmul.mubr.msk.f32.vlgmr.msra.gmra.mxu1 %vm294_vm2, %v1615_v43  ;;  %3558 = vmatmul.mubr.msk.f32.vlgmr.msra.gmra.mxu0 %vm294_vm2, %v1615_v43 }
0x1098   :  { %3539 = vmatpush3.msra.mxu1 %v4149_v30  ;;  %3572 = vmatpush3.msra.mxu0 %v4110_v2  ;;  %v1788_v2 = vpop.permute.xlu1 %1787 }
0x1099   :  { %3540 = vmatprep.subr.mxu1 %v4016_v0  ;;  %3573 = vmatprep.subr.mxu0 %v4016_v0 }
0x109a   :  { %3541 = vmatpush3.msra.mxu1 %v4155_v32  ;;  %3574 = vmatpush3.msra.mxu0 %v4113_v4 }
0x109b   :  { %3542 = vmatprep.subr.mxu1 %v4016_v0  ;;  %3575 = vmatprep.subr.mxu0 %v4016_v0 }
0x109c   :  { %3543 = vmatpush3.msra.mxu1 %v4161_v35  ;;  %3576 = vmatpush3.msra.mxu0 %v4117_v7 }
0x109d   :  { %3544 = vmatprep.subr.mxu1 %v4016_v0  ;;  %3577 = vmatprep.subr.mxu0 %v4016_v0 }
0x109e   :  { %3545 = vmatpush3.msra.mxu1 %v4169_v37  ;;  %3546 = vmatprep.mubr.msk.f32.mxu1 %vm4017_vm0, %v4016_v0 }
0x109f   :  { %3578 = vmatpush3.msra.mxu0 %v4122_v8  ;;  %3579 = vmatprep.mubr.msk.f32.mxu0 %vm4017_vm0, %v4016_v0 }
0x10a0   :  { %3547 = vmatmul.mubr.msk.f32.vlgmr.msra.gmra.mxu1 %vm294_vm2, %v1788_v2  ;;  %3580 = vmatmul.mubr.msk.f32.vlgmr.msra.gmra.mxu0 %vm294_vm2, %v1788_v2 }
0x10a1   :  { %3560 = vmatprep.subr.mxu1 %v4016_v0  ;;  %3593 = vmatprep.subr.mxu0 %v4016_v0 }
0x10a2   :  { %3594 = vmatpush3.msra.mxu0 %v4145_v28  ;;  %3568 = vmatprep.mubr.msk.f32.mxu1 %vm4017_vm0, %v4016_v0 }
0x10a3   :  { %3595 = vmatprep.subr.mxu0 %v4016_v0  ;;  %3601 = vmatprep.mubr.msk.f32.mxu0 %vm4017_vm0, %v4016_v0 }
0x10a4   :  { %3596 = vmatpush3.msra.mxu0 %v4153_v31  ;;  %v267_v31 = vadd.f32 %v4224_v46, %v4137_v10  ;;  %3561 = vmatpush3.msra.mxu1 %v1960_v11  ;;  %v2306_v11 = vld [vmem:[#allocation12 + $0xa8] sm:$0xff] }
0x10a5   :  { %3597 = vmatprep.subr.mxu0 %v4016_v0  ;;  %3562 = vmatprep.subr.mxu1 %v4016_v0 }
0x10a6   :  { %3598 = vmatpush3.msra.mxu0 %v4165_v36  ;;  %3563 = vmatpush3.msra.mxu1 %v1959_v9  ;;  %v2305_v9 = vld [vmem:[#allocation12 + $0xa0] sm:$0xff] }
0x10a7   :  { %3599 = vmatprep.subr.mxu0 %v4016_v0  ;;  %3564 = vmatprep.subr.mxu1 %v4016_v0 }
0x10a8   :  { %3600 = vmatpush3.msra.mxu0 %v4175_v39  ;;  %3565 = vmatpush3.msra.mxu1 %v1958_v12 }
0x10a9   :  { %3615 = vmatprep.subr.mxu0 %v4016_v0  ;;  %3566 = vmatprep.subr.mxu1 %v4016_v0 }
0x10aa   :  { %3567 = vmatpush3.msra.mxu1 %v1957_v15 }
0x10ab   :  { %3582 = vmatprep.subr.mxu1 %v4016_v0 }
0x1157   :  { %v1684_v4 = vpop.f32.mrf.mxu1  ;;  %v1927_v7 = vpop.f32.mrf.mxu0 }
0x1158   :  { %v4473_v8 = vadd.f32 %v1684_v4, %v4411_v22 }
0x1159   :  { %v3526_v28 = vpop.f32.mrf.mxu1  ;;  %v3559_v30 = vpop.f32.mrf.mxu0 }
0x115a   :  { %v4564_v28 = vld [vmem:[%s4683_s3] ss:$0 sm:$0xff] }
0x115b   :  { %v268_v30 = vadd.f32 %v4564_v28, %v4230_v49 }
0x1160   :  { %v1857_v32 = vpop.f32.mrf.mxu1  ;;  %v2105_v35 = vpop.f32.mrf.mxu0 }
0x1161   :  { %v1928_v37 = vadd.f32 %v1927_v7, %v1857_v32  ;;  %v2109_v36 = vadd.f32 %v2105_v35, %v267_v31 }
0x1162   :  { %v3548_v50 = vpop.f32.mrf.mxu1  ;;  %v3581_v51 = vpop.f32.mrf.mxu0 }
0x1163   :  { %v1931_v39 = vadd.f32 %v4235_v53, %v1928_v37  ;;  %3788 = vtanh.f32 %v2109_v36  ;;  %v3147_v22 = vmul.f32 -1.442695, %v2109_v36 }
0x1165   :  { %3790 = vtanh.f32 %v1931_v39  ;;  %v3144_v56 = vmul.f32 -1.442695, %v1931_v39 }
0x1166   :  { %3792 = vpow2.f32 %v3147_v22 }
0x1167   :  { %3794 = vpow2.f32 %v3144_v56 }
0x1170   :  { %v3789_v52 = vpop.eup %3788 }
0x1171   :  { %2119 = vrot.lane.b32.xlu1 %v3789_v52, %s4018_s14 }
0x1172   :  { %v3791_v54 = vpop.eup %3790 }
0x1173   :  { %1941 = vrot.lane.b32.xlu0 %v3791_v54, %s4018_s14  ;;  %v3793_v10 = vpop.eup %3792 }
0x1174   :  { %v3795_v46 = vpop.eup %3794  ;;  %v2113_v57 = vadd.f32 1.0, %v3793_v10 }
0x1175   :  { %v1935_v58 = vadd.f32 1.0, %v3795_v46 }
0x1176   :  { %3796 = vrcp.f32 %v2113_v57 }
0x1177   :  { %3798 = vrcp.f32 %v1935_v58 }
0x1183   :  { %v3797_v59 = vpop.eup %3796 }
0x1184   :  { %v3799_v62 = vpop.eup %3798  ;;  %v2117_v3 = vmul.f32 %v3797_v59, %v4421_v24  ;;  %v4500_v24 = vld [vmem:[#allocation9 + $0x18] sm:$0xff] }
0x1185   :  { %v1939_v5 = vmul.f32 %v3799_v62, %v4425_v33  ;;  %v4511_v33 = vld [vmem:[#allocation8 + $0x10] sm:$0xff] }
0x11e3   :  { %v2120_v60 = vpop.permute.xlu1 %2119 }
0x11e4   :  { %v2122_v61 = vmul.f32 %v3797_v59, %v2120_v60 }
0x11e5   :  { %v1942_v63 = vpop.permute.xlu0 %1941 }
0x11e6   :  { %v1944_v1 = vmul.f32 %v3799_v62, %v1942_v63  ;;  %2124 = vrot.lane.b32.xlu1 %v2122_v61, %s4019_s15 }
0x11e8   :  { %1946 = vrot.lane.b32.xlu0 %v1944_v1, %s4019_s15 }
0x1258   :  { %v2125_v55 = vpop.permute.xlu1 %2124 }
0x1259   :  { %v4483_v18 = vadd.f32 %v2125_v55, %v2117_v3 }
0x125a   :  { %v1947_v44 = vpop.permute.xlu0 %1946 }
0x125b   :  { %3800 = vtanh.f32 %v4483_v18  ;;  %v4487_v47 = vadd.f32 %v1947_v44, %v1939_v5  ;;  %v2308_v5 = vld [vmem:[#allocation12 + $0xb8] sm:$0xff]  ;;  %v2307_v44 = vld [vmem:[#allocation12 + $0xb0] sm:$0xff] }
0x125d   :  { %3802 = vtanh.f32 %v4487_v47 }
0x1268   :  { %v3801_v13 = vpop.eup %3800 }
0x1269   :  { %2130 = vrot.lane.b32.xlu1 %v3801_v13, %s4018_s14 }
0x126a   :  { %v3803_v14 = vpop.eup %3802 }
0x126b   :  { %1952 = vrot.lane.b32.xlu0 %v3803_v14, %s4018_s14 }
0x12db   :  { %v2131_v16 = vpop.permute.xlu1 %2130 }
0x12dc   :  { %v2133_v17 = vmul.f32 %v3797_v59, %v2131_v16 }
0x12dd   :  { %v1953_v19 = vpop.permute.xlu0 %1952 }
0x12de   :  { %v1955_v20 = vmul.f32 %v3799_v62, %v1953_v19  ;;  %2135 = vrot.lane.b32.xlu1 %v2133_v17, %s4019_s15 }
0x12e0   :  { %1962 = vrot.lane.b32.xlu0 %v1955_v20, %s4019_s15 }
0x1350   :  { %v2136_v23 = vpop.permute.xlu1 %2135 }
0x1352   :  { %v1963_v21 = vpop.permute.xlu0 %1962 }
0x1353   :  { %3569 = vmatmul.mubr.msk.f32.vlgmr.msra.gmra.mxu1 %vm294_vm2, %v1963_v21  ;;  %3602 = vmatmul.mubr.msk.f32.vlgmr.msra.gmra.mxu0 %vm294_vm2, %v1963_v21 }
0x1354   :  { %3583 = vmatpush3.msra.mxu1 %v4500_v24  ;;  %3616 = vmatpush3.msra.mxu0 %v4503_v26 }
0x1355   :  { %3584 = vmatprep.subr.mxu1 %v4016_v0  ;;  %3617 = vmatprep.subr.mxu0 %v4016_v0 }
0x1356   :  { %3585 = vmatpush3.msra.mxu1 %v4508_v29  ;;  %3618 = vmatpush3.msra.mxu0 %v4511_v33 }
0x1357   :  { %3586 = vmatprep.subr.mxu1 %v4016_v0  ;;  %3619 = vmatprep.subr.mxu0 %v4016_v0 }
0x1358   :  { %3587 = vmatpush3.msra.mxu1 %v4516_v25  ;;  %3620 = vmatpush3.msra.mxu0 %v4519_v6 }
0x1359   :  { %3588 = vmatprep.subr.mxu1 %v4016_v0  ;;  %3621 = vmatprep.subr.mxu0 %v4016_v0 }
0x135a   :  { %3589 = vmatpush3.msra.mxu1 %v4524_v34  ;;  %3590 = vmatprep.mubr.msk.f32.mxu1 %vm4017_vm0, %v4016_v0 }
0x135b   :  { %3622 = vmatpush3.msra.mxu0 %v4529_v27  ;;  %3623 = vmatprep.mubr.msk.f32.mxu0 %vm4017_vm0, %v4016_v0 }
0x135c   :  { %3591 = vmatmul.mubr.msk.f32.vlgmr.msra.gmra.mxu1 %vm294_vm2, %v2136_v23  ;;  %3624 = vmatmul.mubr.msk.f32.vlgmr.msra.gmra.mxu0 %vm294_vm2, %v2136_v23 }
0x135d   :  { %3604 = vmatprep.subr.mxu1 %v4016_v0  ;;  %3637 = vmatprep.subr.mxu0 %v4016_v0 }
0x135e   :  { %3638 = vmatpush3.msra.mxu0 %v4538_v38  ;;  %3612 = vmatprep.mubr.msk.f32.mxu1 %vm4017_vm0, %v4016_v0 }
0x135f   :  { %3639 = vmatprep.subr.mxu0 %v4016_v0  ;;  %3645 = vmatprep.mubr.msk.f32.mxu0 %vm4017_vm0, %v4016_v0 }
0x1360   :  { %3640 = vmatpush3.msra.mxu0 %v4546_v40  ;;  %3605 = vmatpush3.msra.mxu1 %v2308_v5 }
0x1361   :  { %3641 = vmatprep.subr.mxu0 %v4016_v0  ;;  %3606 = vmatprep.subr.mxu1 %v4016_v0 }
0x1362   :  { %3642 = vmatpush3.msra.mxu0 %v4550_v41  ;;  %3607 = vmatpush3.msra.mxu1 %v2307_v44 }
0x1363   :  { %3643 = vmatprep.subr.mxu0 %v4016_v0  ;;  %3608 = vmatprep.subr.mxu1 %v4016_v0 }
0x1364   :  { %3644 = vmatpush3.msra.mxu0 %v4554_v45  ;;  %3609 = vmatpush3.msra.mxu1 %v2306_v11 }
0x1365   :  { %3659 = vmatprep.subr.mxu0 %v4016_v0  ;;  %3610 = vmatprep.subr.mxu1 %v4016_v0 }
0x1366   :  { %3611 = vmatpush3.msra.mxu1 %v2305_v9 }
0x1367   :  { %3626 = vmatprep.subr.mxu1 %v4016_v0 }
0x1413   :  { %v2032_v42 = vpop.f32.mrf.mxu1  ;;  %v2275_v43 = vpop.f32.mrf.mxu0 }
0x1414   :  { %v4559_v2 = vadd.f32 %v2032_v42, %v4473_v8 }
0x1415   :  { %v3570_v4 = vpop.f32.mrf.mxu1  ;;  %v3603_v7 = vpop.f32.mrf.mxu0 }
0x141c   :  { %v2205_v31 = vpop.f32.mrf.mxu1  ;;  %v2453_v32 = vpop.f32.mrf.mxu0 }
0x141d   :  { %v2276_v35 = vadd.f32 %v2275_v43, %v2205_v31  ;;  %v2457_v37 = vadd.f32 %v2453_v32, %v268_v30 }
0x141e   :  { %v3592_v36 = vpop.f32.mrf.mxu1  ;;  %v3625_v50 = vpop.f32.mrf.mxu0 }
0x141f   :  { %v2279_v51 = vadd.f32 %v4235_v53, %v2276_v35  ;;  %3804 = vtanh.f32 %v2457_v37  ;;  %v3153_v52 = vmul.f32 -1.442695, %v2457_v37 }
0x1421   :  { %3806 = vtanh.f32 %v2279_v51  ;;  %v3150_v54 = vmul.f32 -1.442695, %v2279_v51 }
0x1422   :  { %3808 = vpow2.f32 %v3153_v52 }
0x1423   :  { %3810 = vpow2.f32 %v3150_v54 }
0x142c   :  { %v3805_v8 = vpop.eup %3804 }
0x142d   :  { %2467 = vrot.lane.b32.xlu1 %v3805_v8, %s4018_s14 }
0x142e   :  { %v3807_v39 = vpop.eup %3806 }
0x142f   :  { %2289 = vrot.lane.b32.xlu0 %v3807_v39, %s4018_s14  ;;  %v3809_v49 = vpop.eup %3808 }
0x1430   :  { %v3811_v22 = vpop.eup %3810  ;;  %v2461_v56 = vadd.f32 1.0, %v3809_v49 }
0x1431   :  { %v2283_v10 = vadd.f32 1.0, %v3811_v22 }
0x1432   :  { %3812 = vrcp.f32 %v2461_v56 }
0x1433   :  { %3814 = vrcp.f32 %v2283_v10  ;;  %v2656_v10 = vld [vmem:[#allocation12 + $0xd8] sm:$0xff] }
0x143f   :  { %v3813_v46 = vpop.eup %3812 }
0x1440   :  { %v3815_v58 = vpop.eup %3814  ;;  %v2465_v61 = vmul.f32 %v3813_v46, %v4483_v18 }
0x1441   :  { %v2287_v1 = vmul.f32 %v3815_v58, %v4487_v47 }
0x149f   :  { %v2468_v53 = vpop.permute.xlu1 %2467 }
0x14a0   :  { %v2470_v57 = vmul.f32 %v3813_v46, %v2468_v53  ;;  %v2654_v53 = vld [vmem:[#allocation12 + $0xc8] sm:$0xff] }
0x14a1   :  { %v2290_v59 = vpop.permute.xlu0 %2289 }
0x14a2   :  { %v2292_v60 = vmul.f32 %v3815_v58, %v2290_v59  ;;  %2472 = vrot.lane.b32.xlu1 %v2470_v57, %s4019_s15  ;;  %v2653_v59 = vld [vmem:[#allocation12 + $0xc0] sm:$0xff] }
0x14a4   :  { %2294 = vrot.lane.b32.xlu0 %v2292_v60, %s4019_s15 }
0x1514   :  { %v2473_v62 = vpop.permute.xlu1 %2472 }
0x1515   :  { %v4574_v63 = vadd.f32 %v2473_v62, %v2465_v61 }
0x1516   :  { %v2295_v3 = vpop.permute.xlu0 %2294 }
0x1517   :  { %3816 = vtanh.f32 %v4574_v63  ;;  %v4578_v55 = vadd.f32 %v2295_v3, %v2287_v1 }
0x1519   :  { %3818 = vtanh.f32 %v4578_v55 }
0x1524   :  { %v3817_v18 = vpop.eup %3816 }
0x1525   :  { %2478 = vrot.lane.b32.xlu1 %v3817_v18, %s4018_s14 }
0x1526   :  { %v3819_v47 = vpop.eup %3818 }
0x1527   :  { %2300 = vrot.lane.b32.xlu0 %v3819_v47, %s4018_s14 }
0x1597   :  { %v2479_v12 = vpop.permute.xlu1 %2478 }
0x1598   :  { %v2481_v13 = vmul.f32 %v3813_v46, %v2479_v12  ;;  %v2655_v46 = vld [vmem:[#allocation12 + $0xd0] sm:$0xff] }
0x1599   :  { %v2301_v14 = vpop.permute.xlu0 %2300 }
0x159a   :  { %v2303_v15 = vmul.f32 %v3815_v58, %v2301_v14  ;;  %2483 = vrot.lane.b32.xlu1 %v2481_v13, %s4019_s15 }
0x159c   :  { %2310 = vrot.lane.b32.xlu0 %v2303_v15, %s4019_s15 }
0x160c   :  { %v2484_v17 = vpop.permute.xlu1 %2483 }
0x160e   :  { %v2311_v16 = vpop.permute.xlu0 %2310 }
0x160f   :  { %3613 = vmatmul.mubr.msk.f32.vlgmr.msra.gmra.mxu1 %vm294_vm2, %v2311_v16  ;;  %3646 = vmatmul.mubr.msk.f32.vlgmr.msra.gmra.mxu0 %vm294_vm2, %v2311_v16 }
0x1610   :  { %3627 = vmatpush3.msra.mxu1 %v4500_v24  ;;  %3660 = vmatpush3.msra.mxu0 %v4503_v26 }
0x1611   :  { %3628 = vmatprep.subr.mxu1 %v4016_v0  ;;  %3661 = vmatprep.subr.mxu0 %v4016_v0 }
0x1612   :  { %3629 = vmatpush3.msra.mxu1 %v4508_v29  ;;  %3662 = vmatpush3.msra.mxu0 %v4511_v33 }
0x1613   :  { %3630 = vmatprep.subr.mxu1 %v4016_v0  ;;  %3663 = vmatprep.subr.mxu0 %v4016_v0 }
0x1614   :  { %3631 = vmatpush3.msra.mxu1 %v4516_v25  ;;  %3664 = vmatpush3.msra.mxu0 %v4519_v6  ;;  %v269_v6 = vadd.f32 %v4564_v28, %v4228_v48 }
0x1615   :  { %3632 = vmatprep.subr.mxu1 %v4016_v0  ;;  %3665 = vmatprep.subr.mxu0 %v4016_v0 }
0x1616   :  { %3633 = vmatpush3.msra.mxu1 %v4524_v34  ;;  %3634 = vmatprep.mubr.msk.f32.mxu1 %vm4017_vm0, %v4016_v0 }
0x1617   :  { %3666 = vmatpush3.msra.mxu0 %v4529_v27  ;;  %3667 = vmatprep.mubr.msk.f32.mxu0 %vm4017_vm0, %v4016_v0 }
0x1618   :  { %3635 = vmatmul.mubr.msk.f32.vlgmr.msra.gmra.mxu1 %vm294_vm2, %v2484_v17  ;;  %3668 = vmatmul.mubr.msk.f32.vlgmr.msra.gmra.mxu0 %vm294_vm2, %v2484_v17 }
0x1619   :  { %3648 = vmatprep.subr.mxu1 %v4016_v0  ;;  %3681 = vmatprep.subr.mxu0 %v4016_v0 }
0x161a   :  { %3682 = vmatpush3.msra.mxu0 %v4538_v38  ;;  %3656 = vmatprep.mubr.msk.f32.mxu1 %vm4017_vm0, %v4016_v0 }
0x161b   :  { %3683 = vmatprep.subr.mxu0 %v4016_v0  ;;  %3689 = vmatprep.mubr.msk.f32.mxu0 %vm4017_vm0, %v4016_v0 }
0x161c   :  { %3684 = vmatpush3.msra.mxu0 %v4546_v40  ;;  %3649 = vmatpush3.msra.mxu1 %v2656_v10 }
0x161d   :  { %3685 = vmatprep.subr.mxu0 %v4016_v0  ;;  %3650 = vmatprep.subr.mxu1 %v4016_v0 }
0x161e   :  { %3686 = vmatpush3.msra.mxu0 %v4550_v41  ;;  %3651 = vmatpush3.msra.mxu1 %v2655_v46 }
0x161f   :  { %3687 = vmatprep.subr.mxu0 %v4016_v0  ;;  %3652 = vmatprep.subr.mxu1 %v4016_v0 }
0x1620   :  { %3688 = vmatpush3.msra.mxu0 %v4554_v45  ;;  %v4632_v45 = vld [vmem:[%s4686_s6] ss:$0 sm:$0xff]  ;;  %3653 = vmatpush3.msra.mxu1 %v2654_v53 }
0x1621   :  { %3654 = vmatprep.subr.mxu1 %v4016_v0 }
0x1622   :  { %3655 = vmatpush3.msra.mxu1 %v2653_v59 }
0x1623   :  { %3670 = vmatprep.subr.mxu1 %v4016_v0 }
0x16cf   :  { %v2380_v19 = vpop.f32.mrf.mxu1  ;;  %v2623_v20 = vpop.f32.mrf.mxu0 }
0x16d0   :  { %v4625_v21 = vadd.f32 %v2380_v19, %v4559_v2 }
0x16d1   :  { %v3614_v26 = vpop.f32.mrf.mxu1  ;;  %v3647_v33 = vpop.f32.mrf.mxu0 }
0x16d2   :  { %v3003_v26 = vld [vmem:[#allocation12 + $0xf0] sm:$0xff]  ;;  %v3002_v33 = vld [vmem:[#allocation12 + $0xe8] sm:$0xff] }
0x16d8   :  { %v2553_v23 = vpop.f32.mrf.mxu1  ;;  %v2801_v27 = vpop.f32.mrf.mxu0 }
0x16d9   :  { %v2624_v38 = vadd.f32 %v2623_v20, %v2553_v23  ;;  %v2805_v40 = vadd.f32 %v2801_v27, %v269_v6  ;;  %v3001_v6 = vld [vmem:[#allocation12 + $0xe0] sm:$0xff] }
0x16da   :  { %v3636_v42 = vpop.f32.mrf.mxu1  ;;  %v3669_v41 = vpop.f32.mrf.mxu0 }
0x16db   :  { %v2627_v43 = vadd.f32 %v4632_v45, %v2624_v38  ;;  %3820 = vtanh.f32 %v2805_v40  ;;  %v3159_v48 = vmul.f32 -1.442695, %v2805_v40  ;;  %v3164_v41 = vld [vmem:[%s4688_s8] ss:$0 sm:$0xff] }
0x16dd   :  { %3822 = vtanh.f32 %v2627_v43  ;;  %v3156_v7 = vmul.f32 -1.442695, %v2627_v43 }
0x16de   :  { %3824 = vpow2.f32 %v3159_v48 }
0x16df   :  { %3826 = vpow2.f32 %v3156_v7 }
0x16e8   :  { %v3821_v2 = vpop.eup %3820 }
0x16e9   :  { %2815 = vrot.lane.b32.xlu1 %v3821_v2, %s4018_s14 }
0x16ea   :  { %v3823_v4 = vpop.eup %3822 }
0x16eb   :  { %2637 = vrot.lane.b32.xlu0 %v3823_v4, %s4018_s14  ;;  %v3825_v28 = vpop.eup %3824 }
0x16ec   :  { %v3827_v30 = vpop.eup %3826  ;;  %v2809_v31 = vadd.f32 1.0, %v3825_v28 }
0x16ed   :  { %v2631_v32 = vadd.f32 1.0, %v3827_v30 }
0x16ee   :  { %3828 = vrcp.f32 %v2809_v31 }
0x16ef   :  { %3830 = vrcp.f32 %v2631_v32 }
0x16fb   :  { %v3829_v35 = vpop.eup %3828 }
0x16fc   :  { %v3831_v50 = vpop.eup %3830  ;;  %v2813_v39 = vmul.f32 %v3829_v35, %v4574_v63 }
0x16fd   :  { %v2635_v49 = vmul.f32 %v3831_v50, %v4578_v55 }
0x175b   :  { %v2816_v37 = vpop.permute.xlu1 %2815 }
0x175c   :  { %v2818_v36 = vmul.f32 %v3829_v35, %v2816_v37 }
0x175d   :  { %v2638_v51 = vpop.permute.xlu0 %2637 }
0x175e   :  { %v2640_v8 = vmul.f32 %v3831_v50, %v2638_v51  ;;  %2820 = vrot.lane.b32.xlu1 %v2818_v36, %s4019_s15 }
0x1760   :  { %2642 = vrot.lane.b32.xlu0 %v2640_v8, %s4019_s15 }
0x17d0   :  { %v2821_v52 = vpop.permute.xlu1 %2820 }
0x17d1   :  { %v2823_v54 = vadd.f32 %v2821_v52, %v2813_v39 }
0x17d2   :  { %v2643_v22 = vpop.permute.xlu0 %2642 }
0x17d3   :  { %3832 = vtanh.f32 %v2823_v54  ;;  %v2645_v56 = vadd.f32 %v2643_v22, %v2635_v49 }
0x17d5   :  { %3834 = vtanh.f32 %v2645_v56 }
0x17e0   :  { %v3833_v57 = vpop.eup %3832 }
0x17e1   :  { %2826 = vrot.lane.b32.xlu1 %v3833_v57, %s4018_s14 }
0x17e2   :  { %v3835_v58 = vpop.eup %3834 }
0x17e3   :  { %2648 = vrot.lane.b32.xlu0 %v3835_v58, %s4018_s14 }
0x1853   :  { %v2827_v60 = vpop.permute.xlu1 %2826 }
0x1854   :  { %v2829_v61 = vmul.f32 %v3829_v35, %v2827_v60 }
0x1855   :  { %v2649_v62 = vpop.permute.xlu0 %2648 }
0x1856   :  { %v2651_v63 = vmul.f32 %v3831_v50, %v2649_v62  ;;  %2831 = vrot.lane.b32.xlu1 %v2829_v61, %s4019_s15 }
0x1858   :  { %2658 = vrot.lane.b32.xlu0 %v2651_v63, %s4019_s15 }
0x18c8   :  { %v2832_v3 = vpop.permute.xlu1 %2831 }
0x18ca   :  { %v2659_v1 = vpop.permute.xlu0 %2658 }
0x18cb   :  { %3657 = vmatmul.mubr.msk.f32.vlgmr.msra.gmra.mxu1 %vm294_vm2, %v2659_v1  ;;  %3690 = vmatmul.mubr.msk.f32.vlgmr.msra.gmra.mxu0 %vm294_vm2, %v2659_v1 }
0x18cc   :  { %3671 = vmatpush3.msra.mxu1 %v4500_v24  ;;  %3678 = vmatprep.mubr.msk.f32.mxu1 %vm4017_vm0, %v4016_v0 }
0x18cd   :  { %3672 = vmatprep.subr.mxu1 %v4016_v0 }
0x18ce   :  { %3673 = vmatpush3.msra.mxu1 %v4508_v29 }
0x18cf   :  { %3674 = vmatprep.subr.mxu1 %v4016_v0 }
0x18d0   :  { %3675 = vmatpush3.msra.mxu1 %v4516_v25 }
0x18d1   :  { %3676 = vmatprep.subr.mxu1 %v4016_v0 }
0x18d2   :  { %3677 = vmatpush3.msra.mxu1 %v4524_v34 }
0x18d3   :  { %3679 = vmatmul.mubr.msk.f32.vlgmr.msra.gmra.mxu1 %vm294_vm2, %v2832_v3  ;;  %3692 = vmatprep.subr.mxu1 %v4016_v0 }
0x18d4   :  { %3700 = vmatprep.mubr.msk.f32.mxu1 %vm4017_vm0, %v4016_v0 }
0x198b   :  { %v2728_v24 = vpop.f32.mrf.mxu1  ;;  %v2971_v55 = vpop.f32.mrf.mxu0 }
0x198c   :  { %v2732_v29 = vadd.f32 %v2728_v24, %v4625_v21  ;;  %v3004_v21 = vld [vmem:[#allocation12 + $0xf8] sm:$0xff] }
0x198d   :  { %v3658_v5 = vpop.f32.mrf.mxu1  ;;  %v3691_v44 = vpop.f32.mrf.mxu0  ;;  %3693 = vmatpush3.msra.mxu1 %v3004_v21 }
0x198e   :  { %3694 = vmatprep.subr.mxu1 %v4016_v0 }
0x198f   :  { %3695 = vmatpush3.msra.mxu1 %v3003_v26 }
0x1990   :  { %3696 = vmatprep.subr.mxu1 %v4016_v0 }
0x1991   :  { %3697 = vmatpush3.msra.mxu1 %v3002_v33 }
0x1992   :  { %3698 = vmatprep.subr.mxu1 %v4016_v0 }
0x1993   :  { %v2901_v11 = vpop.f32.mrf.mxu1  ;;  %3699 = vmatpush3.msra.mxu1 %v3001_v6 }
0x1994   :  { %v2972_v25 = vadd.f32 %v2971_v55, %v2901_v11 }
0x1995   :  { %v3680_v18 = vpop.f32.mrf.mxu1 }
0x1996   :  { %v2975_v47 = vadd.f32 %v4632_v45, %v2972_v25 }
0x1998   :  { %3836 = vtanh.f32 %v2975_v47  ;;  %v3162_v9 = vmul.f32 -1.442695, %v2975_v47 }
0x199a   :  { %3838 = vpow2.f32 %v3162_v9 }
0x19a5   :  { %v3837_v34 = vpop.eup %3836 }
0x19a6   :  { %2985 = vrot.lane.b32.xlu0 %v3837_v34, %s4018_s14 }
0x19a7   :  { %v3839_v12 = vpop.eup %3838 }
0x19a8   :  { %v2979_v13 = vadd.f32 1.0, %v3839_v12 }
0x19aa   :  { %3840 = vrcp.f32 %v2979_v13 }
0x19b7   :  { %v3841_v14 = vpop.eup %3840 }
0x19b8   :  { %v2983_v17 = vmul.f32 %v3841_v14, %v2645_v56 }
0x1a18   :  { %v2986_v15 = vpop.permute.xlu0 %2985 }
0x1a19   :  { %v2988_v16 = vmul.f32 %v3841_v14, %v2986_v15 }
0x1a1b   :  { %2990 = vrot.lane.b32.xlu1 %v2988_v16, %s4019_s15 }
0x1a8d   :  { %v2991_v19 = vpop.permute.xlu1 %2990 }
0x1a8e   :  { %v2993_v20 = vadd.f32 %v2991_v19, %v2983_v17 }
0x1a90   :  { %3842 = vtanh.f32 %v2993_v20 }
0x1a9d   :  { %v3843_v23 = vpop.eup %3842 }
0x1a9e   :  { %2996 = vrot.lane.b32.xlu0 %v3843_v23, %s4018_s14 }
0x1b10   :  { %v2997_v27 = vpop.permute.xlu0 %2996 }
0x1b11   :  { %v2999_v38 = vmul.f32 %v3841_v14, %v2997_v27 }
0x1b13   :  { %3006 = vrot.lane.b32.xlu1 %v2999_v38, %s4019_s15 }
0x1b85   :  { %v3007_v40 = vpop.permute.xlu1 %3006 }
0x1b86   :  { %3701 = vmatmul.mubr.msk.f32.vlgmr.msra.gmra.mxu1 %vm294_vm2, %v3007_v40 }
0x1c46   :  { %v3076_v42 = vpop.f32.mrf.mxu1 }
0x1c47   :  { %v3080_v45 = vadd.f32 %v3076_v42, %v2732_v29 }
0x1c48   :  { %v3702_v0 = vpop.f32.mrf.mxu1 }
0x1c49   :  { %v3088_v43 = vadd.f32 %v3164_v41, %v3080_v45 }
0x1c4b   :  { %3089 = vst [vmem:[#allocation14] sm:$0xff] %v3088_v43 }
0x1c4c   :  { %3989 = shalt.err (!%p3986_p6)
}
0x1c4d   :  { %3099 = dma.vmem_to_hbm [thread:$0]  %s3097_s1, 128, %s4689_s9, [#allocation5]  }
0x1c4e   :  { %4006 = dma.done.wait [#allocation5], 128  }
0x1c4f   :  { %4007 = vsyncadd [#allocation5], 4294967168 }
0x1c50   :  { %3103 = vsyncpa [#allocation4], 1 }
0x1c51   :  { %3104 = vsyncpa [#allocation7], 1 }
0x1c52   :  { %3105 = vsyncpa [#allocation10], 1 }
0x1c53   :  { %3106 = vsyncpa [#allocation13], 1 }
0x1c54   :  { %3107 = vsyncpa [#allocation5], 1 }

</bundles_post_ra>
